<compile_context>
chip_gen: v7x
topology: tpu7x:2x2x1
jax: 0.10.0
libtpu: 0.0.40
codegen_flags: <defaults>
</compile_context>

<pallas_src>
import functools

import jax
import jax.numpy as jnp
from jax.experimental import pallas as pl
from jax.experimental.pallas import tpu as pltpu


def _round_up(x, m):
    return ((x + m - 1) // m) * m


# ------------------------------------------------------------------ kernel ---
def dqn_rollout_kernel(x_ref, h0_ref, wT_ref, uT_ref, w1T_ref, b1_ref,
                       w2T_ref, b2_ref, state_ref, out_ref, h_scr, s_stack):
    """One grid step == one timestep of the recurrence.

    Weights are VMEM-resident across the whole grid (constant index_maps);
    h is carried in `h_scr`; per-step states are stacked into `s_stack` so the
    FLOP-dominant fc1/fc2 matmuls run once at the last step with M = T*Bp.
    """
    t = pl.program_id(0)
    n_t = pl.num_programs(0)
    Bp = x_ref.shape[0]                                  # x block is (Bp, Sp)

    @pl.when(t == 0)
    def _():
        h_scr[...] = h0_ref[...]

    # --- recurrent cell: state = sigmoid(x @ W^T + h @ U^T) ------------------
    x = x_ref[...]                                       # (Bp, Sp) bf16
    h = h_scr[...]                                       # (Bp, Sp) bf16
    pre = (jnp.dot(x, wT_ref[...], preferred_element_type=jnp.float32)
           + jnp.dot(h, uT_ref[...], preferred_element_type=jnp.float32))
    s = jax.nn.sigmoid(pre)                              # f32 elementwise (EUP)
    state_ref[...] = s.astype(state_ref.dtype)           # per-step writeback

    s_b = s.astype(h_scr.dtype)
    h_scr[...] = s_b                                     # carry h_t
    row = pl.multiple_of(t * Bp, Bp)                     # Bp is a multiple of 16
    s_stack[pl.ds(row, Bp), :] = s_b                     # stack for batched MLP

    # --- batched MLP over all T steps, last grid step only -------------------
    @pl.when(t == n_t - 1)
    def _():
        big = s_stack[...]                                           # (T*Bp, Sp)
        a1 = jnp.dot(big, w1T_ref[...],
                     preferred_element_type=jnp.float32) + b1_ref[...]
        a1 = jnp.maximum(a1, 0.0)
        out = jnp.dot(a1.astype(w2T_ref.dtype), w2T_ref[...],
                      preferred_element_type=jnp.float32) + b2_ref[...]
        out_ref[...] = out.astype(out_ref.dtype)                     # (T*Bp, Ap)


# -------------------------------------------------- one-time param packing ---
def prepare_params(params, lane=128, weight_dtype=jnp.bfloat16):
    """Pad / transpose / cast weights ONCE (outside the jitted rollout call)."""
    W, U = params["W"], params["U"]
    fc1_w, fc1_b = params["fc1_w"], params["fc1_b"]
    fc2_w, fc2_b = params["fc2_w"], params["fc2_b"]

    S = W.shape[0]
    H = fc1_w.shape[0]                       # 512 (already lane multiple)
    A = fc2_w.shape[0]
    Sp = _round_up(S, lane)
    Ap = _round_up(A, lane)

    # Zero-padded rows of uT and w1T are load-bearing: they neutralize
    # sigmoid(0)=0.5 in the padded state lanes when state is carried / used.
    wT = jnp.pad(W.T, ((0, Sp - S), (0, Sp - S)))        # (Sp, Sp)
    uT = jnp.pad(U.T, ((0, Sp - S), (0, Sp - S)))        # (Sp, Sp)
    w1T = jnp.pad(fc1_w.T, ((0, Sp - S), (0, 0)))        # (Sp, H)
    w2T = jnp.pad(fc2_w.T, ((0, 0), (0, Ap - A)))        # (H, Ap)
    b1 = fc1_b.reshape(1, H).astype(jnp.float32)
    b2 = jnp.pad(fc2_b, (0, Ap - A)).reshape(1, Ap).astype(jnp.float32)

    packed = {
        "wT": wT.astype(weight_dtype),
        "uT": uT.astype(weight_dtype),
        "w1T": w1T.astype(weight_dtype),
        "b1": b1,
        "w2T": w2T.astype(weight_dtype),
        "b2": b2,
    }
    dims = {"S": S, "Sp": Sp, "H": H, "A": A, "Ap": Ap}
    return packed, dims


# ----------------------------------------------------------------- wrapper ---
@functools.partial(jax.jit, static_argnames=("S", "Sp", "H", "A", "Ap"))
def dqn_rollout(xs, h0, packed, *, S, Sp, H, A, Ap):
    """xs: (T, B, state_size) f32; h0: (B, state_size) f32.

    Returns (states, outputs); (states[t], outputs[t]) is exactly what the
    PyTorch module's forward returns for (xs[t], h_{t-1}), with h_{-1} = h0
    and h_t = states[t] (padded state is carried internally, never re-padded).
    """
    T, B, _ = xs.shape
    Bp = _round_up(B, 16)                   # bf16 packs 16 rows per sublane group
    wdtype = packed["wT"].dtype

    # One pad + cast per rollout (amortized over T steps).
    x_p = jnp.pad(xs, ((0, 0), (0, Bp - B), (0, Sp - S))).astype(wdtype)
    h_p = jnp.pad(h0, ((0, Bp - B), (0, Sp - S))).astype(wdtype)

    weight_bytes = 2 * (2 * Sp * Sp + Sp * H + H * Ap) + 4 * (H + Ap)
    act_bytes = (T * Bp * Sp + Bp * Sp) * 2 + (T * Bp * Sp + T * Bp * Ap) * 4
    cost = pl.CostEstimate(
        flops=2 * T * Bp * (2 * Sp * Sp + Sp * H + H * Ap),
        transcendentals=T * Bp * Sp,
        bytes_accessed=int(weight_bytes + act_bytes),
    )

    const2 = lambda t: (0, 0)
    grid_spec = pltpu.PrefetchScalarGridSpec(
        num_scalar_prefetch=0,
        grid=(T,),
        in_specs=[
            pl.BlockSpec((None, Bp, Sp), lambda t: (t, 0, 0)),   # x_t block
            pl.BlockSpec((Bp, Sp), const2),                      # h0   (resident)
            pl.BlockSpec((Sp, Sp), const2),                      # W^T  (resident)
            pl.BlockSpec((Sp, Sp), const2),                      # U^T  (resident)
            pl.BlockSpec((Sp, H), const2),                       # fc1_w^T
            pl.BlockSpec((1, H), const2),                        # fc1_b
            pl.BlockSpec((H, Ap), const2),                       # fc2_w^T
            pl.BlockSpec((1, Ap), const2),                       # fc2_b
        ],
        out_specs=(
            pl.BlockSpec((None, Bp, Sp), lambda t: (t, 0, 0)),   # per-step state
            pl.BlockSpec((T * Bp, Ap), const2),                  # outputs (resident)
        ),
        scratch_shapes=[
            pltpu.VMEM((Bp, Sp), wdtype),         # h carry
            pltpu.VMEM((T * Bp, Sp), wdtype),     # stacked states for batched MLP
        ],
    )

    states_p, out_flat = pl.pallas_call(
        dqn_rollout_kernel,
        out_shape=(jax.ShapeDtypeStruct((T, Bp, Sp), jnp.float32),
                   jax.ShapeDtypeStruct((T * Bp, Ap), jnp.float32)),
        grid_spec=grid_spec,
        compiler_params=pltpu.CompilerParams(
            dimension_semantics=("arbitrary",)),   # h carry => sequential time axis
        cost_estimate=cost,
    )(x_p, h_p, packed["wT"], packed["uT"], packed["w1T"], packed["b1"],
      packed["w2T"], packed["b2"])

    out_p = out_flat.reshape(T, Bp, Ap)
    # Slice the lane/sublane padding back off (only at the rollout boundary).
    return states_p[:, :B, :S], out_p[:, :B, :A]


def dqn_forward(x_t, h_t_1, packed, dims):
    """Single-step call with the exact module signature/semantics."""
    states, outputs = dqn_rollout(x_t[None], h_t_1, packed, **dims)
    return states[0], outputs[0]


# ------------------------------------------------------------ param init -----
def xavier_uniform(key, shape):
    fan_in, fan_out = shape[1], shape[0]
    limit = jnp.sqrt(6.0 / (fan_in + fan_out))
    return jax.random.uniform(key, shape, jnp.float32, -limit, limit)


def kaiming_normal(key, shape):
    fan_in = shape[1]
    std = jnp.sqrt(2.0 / fan_in)
    return std * jax.random.normal(key, shape, jnp.float32)


def linear_bias(key, fan_in, n):
    bound = 1.0 / jnp.sqrt(fan_in)
    return jax.random.uniform(key, (n,), jnp.float32, -bound, bound)


def init_params(key, state_size, action_size, hidden=512):
    ks = jax.random.split(key, 6)
    return {
        "W":     xavier_uniform(ks[0], (state_size, state_size)),
        "U":     xavier_uniform(ks[1], (state_size, state_size)),
        "fc1_w": xavier_uniform(ks[2], (hidden, state_size)),
        "fc1_b": linear_bias(ks[3], state_size, hidden),
        "fc2_w": kaiming_normal(ks[4], (action_size, hidden)),
        "fc2_b": linear_bias(ks[5], hidden, action_size),
    }


# -------------------------------------------------------------------- main ---
if __name__ == "__main__":
    # EMB_SIZE -> state_size = 100, action_size = |drug vocab| (synthetic 131),
    # fc1 hidden fixed at 512 (as in the module). T = 8 recurrent steps.
    T, B, STATE_SIZE, ACTION_SIZE = 8, 4, 100, 131

    key = jax.random.PRNGKey(0)
    k_p, k_x, k_h = jax.random.split(key, 3)
    params = init_params(k_p, STATE_SIZE, ACTION_SIZE)

    # One-time packing (pad / transpose / bf16 cast) — NOT in the jitted path.
    packed, dims = prepare_params(params)
    packed = jax.device_put(packed)

    xs = jax.random.normal(k_x, (T, B, STATE_SIZE), jnp.float32)
    h0 = jax.random.normal(k_h, (B, STATE_SIZE), jnp.float32)

    states, outputs = dqn_rollout(xs, h0, packed, **dims)
    jax.block_until_ready((states, outputs))

    # Plain-JAX f32 reference rollout (bf16 weights/activations in the kernel
    # -> loose tolerances).
    ref_states, ref_outs = [], []
    h = h0
    for t in range(T):
        s = jax.nn.sigmoid(xs[t] @ params["W"].T + h @ params["U"].T)
        f1 = jnp.maximum(s @ params["fc1_w"].T + params["fc1_b"], 0.0)
        o = f1 @ params["fc2_w"].T + params["fc2_b"]
        ref_states.append(s)
        ref_outs.append(o)
        h = s
    ref_states = jnp.stack(ref_states)
    ref_outs = jnp.stack(ref_outs)

    assert states.shape == (T, B, STATE_SIZE)
    assert outputs.shape == (T, B, ACTION_SIZE)
    assert jnp.allclose(states, ref_states, atol=5e-2, rtol=5e-2), \
        float(jnp.max(jnp.abs(states - ref_states)))
    assert jnp.allclose(outputs, ref_outs, atol=2e-1, rtol=1e-1), \
        float(jnp.max(jnp.abs(outputs - ref_outs)))

    # Single-step call (exact module forward signature) also works.
    s1, o1 = dqn_forward(xs[0], h0, packed, dims)
    jax.block_until_ready((s1, o1))
    assert s1.shape == (B, STATE_SIZE) and o1.shape == (B, ACTION_SIZE)
    assert jnp.allclose(s1, ref_states[0], atol=5e-2, rtol=5e-2)
    assert jnp.allclose(o1, ref_outs[0], atol=2e-1, rtol=1e-1)

    print("KERNEL_OK")
</pallas_src>

<mosaic_0001>
module attributes {stable_mosaic.version = 11 : i64} {
  func.func @dqn_rollout_kernel(%arg0: i32, %arg1: memref<1x16x128xbf16, #tpu.memory_space<vmem>>, %arg2: memref<16x128xbf16, #tpu.memory_space<vmem>>, %arg3: memref<128x128xbf16, #tpu.memory_space<vmem>>, %arg4: memref<128x128xbf16, #tpu.memory_space<vmem>>, %arg5: memref<128x512xbf16, #tpu.memory_space<vmem>>, %arg6: memref<1x512xf32, #tpu.memory_space<vmem>>, %arg7: memref<512x256xbf16, #tpu.memory_space<vmem>>, %arg8: memref<1x256xf32, #tpu.memory_space<vmem>>, %arg9: memref<1x16x128xf32, #tpu.memory_space<vmem>>, %arg10: memref<128x256xf32, #tpu.memory_space<vmem>>, %arg11: memref<16x128xbf16, #tpu.memory_space<vmem>>, %arg12: memref<128x128xbf16, #tpu.memory_space<vmem>>) attributes {dimension_semantics = [#tpu.dimension_semantics<arbitrary>], iteration_bounds = array<i64: 8>, scalar_prefetch = 0 : i64, scratch_operands = 2 : i64, tpu.core_type = #tpu.core_type<tc>, window_params = [{transform_indices = @transform_0, window_bounds = array<i64: 1, 16, 128>}, {pipeline_mode = #tpu.pipeline_mode<synchronous>, transform_indices = @transform_1, window_bounds = array<i64: 16, 128>}, {pipeline_mode = #tpu.pipeline_mode<synchronous>, transform_indices = @transform_2, window_bounds = array<i64: 128, 128>}, {pipeline_mode = #tpu.pipeline_mode<synchronous>, transform_indices = @transform_3, window_bounds = array<i64: 128, 128>}, {pipeline_mode = #tpu.pipeline_mode<synchronous>, transform_indices = @transform_4, window_bounds = array<i64: 128, 512>}, {pipeline_mode = #tpu.pipeline_mode<synchronous>, transform_indices = @transform_5, window_bounds = array<i64: 1, 512>}, {pipeline_mode = #tpu.pipeline_mode<synchronous>, transform_indices = @transform_6, window_bounds = array<i64: 512, 256>}, {pipeline_mode = #tpu.pipeline_mode<synchronous>, transform_indices = @transform_7, window_bounds = array<i64: 1, 256>}, {transform_indices = @transform_8, window_bounds = array<i64: 1, 16, 128>}, {pipeline_mode = #tpu.pipeline_mode<synchronous>, transform_indices = @transform_9, window_bounds = array<i64: 128, 256>}]} {
    %c0_i32 = arith.constant 0 : i32
    %0 = arith.cmpi eq, %arg0, %c0_i32 : i32
    %1 = arith.extui %0 : i1 to i32
    %c0_i32_0 = arith.constant 0 : i32
    %2 = arith.cmpi ne, %1, %c0_i32_0 : i32
    scf.if %2 {
      %c0_18 = arith.constant 0 : index
      %c0_19 = arith.constant 0 : index
      %28 = vector.load %arg2[%c0_18, %c0_19] : memref<16x128xbf16, #tpu.memory_space<vmem>>, vector<16x128xbf16>
      %c0_20 = arith.constant 0 : index
      %c0_21 = arith.constant 0 : index
      %29 = vector.load %arg11[%c0_20, %c0_21] : memref<16x128xbf16, #tpu.memory_space<vmem>>, vector<16x128xbf16>
      tpu.vector_store %arg11[%c0_20, %c0_21], %28 {strides = array<i32>} : memref<16x128xbf16, #tpu.memory_space<vmem>>, vector<16x128xbf16>,
    } else {
    }
    %c0 = arith.constant 0 : index
    %c0_1 = arith.constant 0 : index
    %c0_2 = arith.constant 0 : index
    %3 = vector.load %arg1[%c0, %c0_1, %c0_2] : memref<1x16x128xbf16, #tpu.memory_space<vmem>>, vector<1x16x128xbf16>
    %4 = vector.shape_cast %3 : vector<1x16x128xbf16> to vector<16x128xbf16>
    %c0_3 = arith.constant 0 : index
    %c0_4 = arith.constant 0 : index
    %5 = vector.load %arg11[%c0_3, %c0_4] : memref<16x128xbf16, #tpu.memory_space<vmem>>, vector<16x128xbf16>
    %c0_5 = arith.constant 0 : index
    %c0_6 = arith.constant 0 : index
    %6 = vector.load %arg3[%c0_5, %c0_6] : memref<128x128xbf16, #tpu.memory_space<vmem>>, vector<128x128xbf16>
    %cst = arith.constant dense<0.000000e+00> : vector<16x128xf32>
    %7 = tpu.matmul %4, %6, %cst {dimension_numbers = #tpu.dot_dimension_numbers<[1], [0], [0], [1], [0, 0, 1, 1], [], []>} : vector<16x128xbf16>, vector<128x128xbf16>, vector<16x128xf32> -> vector<16x128xf32>
    %c0_7 = arith.constant 0 : index
    %c0_8 = arith.constant 0 : index
    %8 = vector.load %arg4[%c0_7, %c0_8] : memref<128x128xbf16, #tpu.memory_space<vmem>>, vector<128x128xbf16>
    %cst_9 = arith.constant dense<0.000000e+00> : vector<16x128xf32>
    %9 = tpu.matmul %5, %8, %cst_9 {dimension_numbers = #tpu.dot_dimension_numbers<[1], [0], [0], [1], [0, 0, 1, 1], [], []>} : vector<16x128xbf16>, vector<128x128xbf16>, vector<16x128xf32> -> vector<16x128xf32>
    %10 = arith.addf %7, %9 : vector<16x128xf32>
    %11 = arith.negf %10 : vector<16x128xf32>
    %12 = math.exp %11 : vector<16x128xf32>
    %cst_10 = arith.constant 1.000000e+00 : f32
    %13 = vector.broadcast %cst_10 : f32 to vector<16x128xf32>
    %14 = arith.addf %13, %12 : vector<16x128xf32>
    %15 = arith.divf %13, %14 : vector<16x128xf32>
    %c0_11 = arith.constant 0 : index
    %c0_12 = arith.constant 0 : index
    %c0_13 = arith.constant 0 : index
    %16 = vector.load %arg9[%c0_11, %c0_12, %c0_13] : memref<1x16x128xf32, #tpu.memory_space<vmem>>, vector<1x16x128xf32>
    %17 = vector.shape_cast %16 : vector<1x16x128xf32> to vector<16x128xf32>
    %18 = vector.shape_cast %15 : vector<16x128xf32> to vector<1x16x128xf32>
    tpu.vector_store %arg9[%c0_11, %c0_12, %c0_13], %18 {strides = array<i32>} : memref<1x16x128xf32, #tpu.memory_space<vmem>>, vector<1x16x128xf32>,
    %19 = arith.truncf %15 : vector<16x128xf32> to vector<16x128xbf16>
    %c0_14 = arith.constant 0 : index
    %c0_15 = arith.constant 0 : index
    %20 = vector.load %arg11[%c0_14, %c0_15] : memref<16x128xbf16, #tpu.memory_space<vmem>>, vector<16x128xbf16>
    tpu.vector_store %arg11[%c0_14, %c0_15], %19 {strides = array<i32>} : memref<16x128xbf16, #tpu.memory_space<vmem>>, vector<16x128xbf16>,
    %c16_i32 = arith.constant 16 : i32
    %21 = arith.muli %arg0, %c16_i32 : i32
    %22 = tpu.assume_multiple %21, 16 : i32
    %23 = arith.index_cast %22 : i32 to index
    %c0_16 = arith.constant 0 : index
    %24 = vector.load %arg12[%23, %c0_16] : memref<128x128xbf16, #tpu.memory_space<vmem>>, vector<16x128xbf16>
    tpu.vector_store %arg12[%23, %c0_16], %19 {strides = array<i32>} : memref<128x128xbf16, #tpu.memory_space<vmem>>, vector<16x128xbf16>,
    %c7_i32 = arith.constant 7 : i32
    %25 = arith.cmpi eq, %arg0, %c7_i32 : i32
    %26 = arith.extui %25 : i1 to i32
    %c0_i32_17 = arith.constant 0 : i32
    %27 = arith.cmpi ne, %26, %c0_i32_17 : i32
    scf.if %27 {
      %c0_18 = arith.constant 0 : index
      %c0_19 = arith.constant 0 : index
      %28 = vector.load %arg12[%c0_18, %c0_19] : memref<128x128xbf16, #tpu.memory_space<vmem>>, vector<128x128xbf16>
      %c0_20 = arith.constant 0 : index
      %c0_21 = arith.constant 0 : index
      %29 = vector.load %arg5[%c0_20, %c0_21] : memref<128x512xbf16, #tpu.memory_space<vmem>>, vector<128x512xbf16>
      %cst_22 = arith.constant dense<0.000000e+00> : vector<128x512xf32>
      %30 = tpu.matmul %28, %29, %cst_22 {dimension_numbers = #tpu.dot_dimension_numbers<[1], [0], [0], [1], [0, 0, 1, 1], [], []>} : vector<128x128xbf16>, vector<128x512xbf16>, vector<128x512xf32> -> vector<128x512xf32>
      %c0_23 = arith.constant 0 : index
      %c0_24 = arith.constant 0 : index
      %31 = vector.load %arg6[%c0_23, %c0_24] : memref<1x512xf32, #tpu.memory_space<vmem>>, vector<1x512xf32>
      %32 = vector.broadcast %31 : vector<1x512xf32> to vector<128x512xf32>
      %33 = arith.addf %30, %32 : vector<128x512xf32>
      %cst_25 = arith.constant 0.000000e+00 : f32
      %34 = vector.broadcast %cst_25 : f32 to vector<128x512xf32>
      %35 = arith.maximumf %33, %34 : vector<128x512xf32>
      %36 = arith.truncf %35 : vector<128x512xf32> to vector<128x512xbf16>
      %c0_26 = arith.constant 0 : index
      %c0_27 = arith.constant 0 : index
      %37 = vector.load %arg7[%c0_26, %c0_27] : memref<512x256xbf16, #tpu.memory_space<vmem>>, vector<512x256xbf16>
      %cst_28 = arith.constant dense<0.000000e+00> : vector<128x256xf32>
      %38 = tpu.matmul %36, %37, %cst_28 {dimension_numbers = #tpu.dot_dimension_numbers<[1], [0], [0], [1], [0, 0, 1, 1], [], []>} : vector<128x512xbf16>, vector<512x256xbf16>, vector<128x256xf32> -> vector<128x256xf32>
      %c0_29 = arith.constant 0 : index
      %c0_30 = arith.constant 0 : index
      %39 = vector.load %arg8[%c0_29, %c0_30] : memref<1x256xf32, #tpu.memory_space<vmem>>, vector<1x256xf32>
      %40 = vector.broadcast %39 : vector<1x256xf32> to vector<128x256xf32>
      %41 = arith.addf %38, %40 : vector<128x256xf32>
      %c0_31 = arith.constant 0 : index
      %c0_32 = arith.constant 0 : index
      %42 = vector.load %arg10[%c0_31, %c0_32] : memref<128x256xf32, #tpu.memory_space<vmem>>, vector<128x256xf32>
      tpu.vector_store %arg10[%c0_31, %c0_32], %41 {strides = array<i32>} : memref<128x256xf32, #tpu.memory_space<vmem>>, vector<128x256xf32>,
    } else {
    }
    return
  }
  func.func @transform_0(%arg0: i32) -> (i32, i32, i32) {
    %c0_i32 = arith.constant 0 : i32
    %c0_i32_0 = arith.constant 0 : i32
    %c0_i32_1 = arith.constant 0 : i32
    return %arg0, %c0_i32, %c0_i32_0 : i32, i32, i32
  }
  func.func @transform_1(%arg0: i32) -> (i32, i32) {
    %c0_i32 = arith.constant 0 : i32
    %c0_i32_0 = arith.constant 0 : i32
    %c0_i32_1 = arith.constant 0 : i32
    return %c0_i32, %c0_i32_0 : i32, i32
  }
  func.func @transform_2(%arg0: i32) -> (i32, i32) {
    %c0_i32 = arith.constant 0 : i32
    %c0_i32_0 = arith.constant 0 : i32
    %c0_i32_1 = arith.constant 0 : i32
    return %c0_i32, %c0_i32_0 : i32, i32
  }
  func.func @transform_3(%arg0: i32) -> (i32, i32) {
    %c0_i32 = arith.constant 0 : i32
    %c0_i32_0 = arith.constant 0 : i32
    %c0_i32_1 = arith.constant 0 : i32
    return %c0_i32, %c0_i32_0 : i32, i32
  }
  func.func @transform_4(%arg0: i32) -> (i32, i32) {
    %c0_i32 = arith.constant 0 : i32
    %c0_i32_0 = arith.constant 0 : i32
    %c0_i32_1 = arith.constant 0 : i32
    return %c0_i32, %c0_i32_0 : i32, i32
  }
  func.func @transform_5(%arg0: i32) -> (i32, i32) {
    %c0_i32 = arith.constant 0 : i32
    %c0_i32_0 = arith.constant 0 : i32
    %c0_i32_1 = arith.constant 0 : i32
    return %c0_i32, %c0_i32_0 : i32, i32
  }
  func.func @transform_6(%arg0: i32) -> (i32, i32) {
    %c0_i32 = arith.constant 0 : i32
    %c0_i32_0 = arith.constant 0 : i32
    %c0_i32_1 = arith.constant 0 : i32
    return %c0_i32, %c0_i32_0 : i32, i32
  }
  func.func @transform_7(%arg0: i32) -> (i32, i32) {
    %c0_i32 = arith.constant 0 : i32
    %c0_i32_0 = arith.constant 0 : i32
    %c0_i32_1 = arith.constant 0 : i32
    return %c0_i32, %c0_i32_0 : i32, i32
  }
  func.func @transform_8(%arg0: i32) -> (i32, i32, i32) {
    %c0_i32 = arith.constant 0 : i32
    %c0_i32_0 = arith.constant 0 : i32
    %c0_i32_1 = arith.constant 0 : i32
    return %arg0, %c0_i32, %c0_i32_0 : i32, i32, i32
  }
  func.func @transform_9(%arg0: i32) -> (i32, i32) {
    %c0_i32 = arith.constant 0 : i32
    %c0_i32_0 = arith.constant 0 : i32
    %c0_i32_1 = arith.constant 0 : i32
    return %c0_i32, %c0_i32_0 : i32, i32
  }
}

</mosaic_0001>

<bundles_post_ra>
// kernel: dqn_rollout.1
= control target key start
LH: loop header
LB: loop body
LE: loop exit
PB: predicated region body
PF: predicated region fallthrough
CT: control target
= control target key end

     0   :  { %15 = vsyncpa [#allocation5], 0  ;;  %s2897_s0 = inlined_call_operand.vmem [shape: bf16[8,16,128], index: 0, kind: input, shape index: {}]   ;;  %s2898_s1 = inlined_call_operand.vmem [shape: bf16[16,128], index: 1, kind: input, shape index: {}]   ;;  %s2899_s2 = inlined_call_operand.vmem [shape: bf16[128,128], index: 2, kind: input, shape index: {}]   ;;  %s2900_s3 = inlined_call_operand.vmem [shape: bf16[128,128], index: 3, kind: input, shape index: {}]   ;;  %s2901_s4 = inlined_call_operand.hbm [shape: bf16[128,512], index: 4, kind: input, shape index: {}]   ;;  %s2902_s5 = inlined_call_operand.vmem [shape: f32[1,512], index: 5, kind: input, shape index: {}]   ;;  %s2903_s6 = inlined_call_operand.hbm [shape: bf16[512,256], index: 6, kind: input, shape index: {}]   ;;  %s2904_s7 = inlined_call_operand.vmem [shape: f32[1,256], index: 7, kind: input, shape index: {}]   ;;  %s2905_s8 = inlined_call_operand.vmem [shape: f32[8,16,128], index: 8, kind: output, shape index: {0}]   ;;  %s2906_s9 = inlined_call_operand.vmem [shape: f32[128,256], index: 9, kind: output, shape index: {1}]  }
   0x1   :  { %16 = vsyncpa [#allocation7], 0  ;;  %s2501_s30 = smov 0  }
   0x2 LB: > { %s2442_s10 = smov [#allocation4]   ;;  %s2507_s12 = sadd.s32 4294967295, %s2440_s30   ;;  %s2440_s30 = sphi %s2501_s30, %s22_s30  }
   0x3   : > { %s268_s11 = sshll.u32 %s2442_s10, 4  ;;  %p1905_p0 = scmp.ge.s32.totalorder %s2440_s30, 1  ;;  %s269_s11 = int_to_ptr.vmem [resolvable:$true] %s268_s11 }
   0x4   : > { %p247_p1 = scmp.lt.s32.totalorder %s2440_s30, 9  ;;  %p2907_p4 = scmp.eq.s32.totalorder %s2507_s12, 0 }
   0x5   : > { %s2443_s14 = smov [#allocation6]   ;;  %s2370_s19 = scalar_lea.hbm %s2901_s4, 4096 }
   0x6   : > { %p2512_p3 = pnand %p1905_p0, %p247_p1  ;;  %s284_s15 = sshll.u32 %s2443_s14, 4  ;;  %s2525_s15 = int_to_ptr.vmem [resolvable:$true] %s284_s15 }
   0x7   : > { %p2371_p7 = scmp.ne.s32.totalorder %s2901_s4, %s2370_s19  ;;  %p2377_p11 = scmp.lt.u32.totalorder %s2370_s19, %s2901_s4 }
   0x8   : > { %s2909_s13 = scalar_select %p2512_p3, 1, 0 }
   0x9   : > { %p2172_p5 = pneg %p2512_p3 }
   0xb   : > { %p2521_p6 = pnand %p2907_p4, %p2172_p5 }
   0xd   : > { %p2372_p8 = pneg %p2521_p6 }
   0xf   : > { %p2373_p9 = pnand %p2372_p8, %p2371_p7 }
  0x11   : > { %p2374_p10 = pneg %p2373_p9 }
  0x13   : > { %p2379_p12 = pnand %p2377_p11, %p2374_p10 }
  0x15   : > { %2382 = shalt.err (!%p2379_p12)
}
  0x16   : > { %s2383_s24 = scalar_lea.vmem %s269_s11, 4096  ;;  %p2391_p5 = scmp.lt.s32.totalorder %s269_s11, %s269_s11 }
  0x17   : > { %p2384_p13 = scmp.ne.s32.totalorder %s269_s11, %s2383_s24  ;;  %p2392_p2 = scmp.lt.s32.totalorder %s2383_s24, %s2383_s24 }
  0x19   : > { %p2386_p0 = pnand %p2384_p13, %p2372_p8  ;;  %p2393_p4 = por %p2392_p2, %p2391_p5 }
  0x1b   : > { %p2387_p1 = pneg %p2386_p0 }
  0x1d   : > { %p2394_p3 = pnand %p2393_p4, %p2387_p1 }
  0x1f   : > { %2397 = shalt.err (!%p2394_p3)
}
  0x20   : > { %s2444_s25 = smov 256   ;;  %s2445_s26 = smov 16  }
  0x21   : > { %2175 = dma.hbm_to_vmem [thread:$0]  (!%p2521_p6), %s2901_s4, 4096, %s269_s11, [#allocation5], %s2444_s25, %s2444_s25, %s2445_s26  }
  0x22   : > { %s2398_s14 = scalar_lea.hbm %s2903_s6, 8192 }
  0x23   : > { %p2399_p7 = scmp.ne.s32.totalorder %s2903_s6, %s2398_s14  ;;  %p2405_p4 = scmp.lt.u32.totalorder %s2398_s14, %s2903_s6 }
  0x25   : > { %p2401_p2 = pnand %p2399_p7, %p2372_p8 }
  0x27   : > { %p2402_p3 = pneg %p2401_p2 }
  0x29   : > { %p2407_p9 = pnand %p2405_p4, %p2402_p3 }
  0x2b   : > { %2410 = shalt.err (!%p2407_p9)
}
  0x2c   : > { %s2411_s11 = scalar_lea.vmem %s2525_s15, 8192  ;;  %p2419_p13 = scmp.lt.s32.totalorder %s2525_s15, %s2525_s15 }
  0x2d   : > { %p2412_p10 = scmp.ne.s32.totalorder %s2525_s15, %s2411_s11  ;;  %p2420_p0 = scmp.lt.s32.totalorder %s2411_s11, %s2411_s11 }
  0x2f   : > { %p2414_p11 = pnand %p2412_p10, %p2372_p8  ;;  %p2421_p1 = por %p2420_p0, %p2419_p13 }
  0x31   : > { %p2415_p12 = pneg %p2414_p11 }
  0x33   : > { %p2422_p5 = pnand %p2421_p1, %p2415_p12 }
  0x35   : > { %2425 = shalt.err (!%p2422_p5)
}
  0x36   : > { %s2446_s21 = smov 128   ;;  %s2447_s22 = smov 8  }
  0x37   : > { %2178 = dma.hbm_to_vmem [thread:$0]  (!%p2521_p6), %s2903_s6, 8192, %s2525_s15, [#allocation7], %s2446_s21, %s2446_s21, %s2447_s22  }
  0x38   : > { %p2911_p7 = scmp.ne.s32.totalorder %s2909_s13, 0 }
  0x39   : > { %p2912_p8 = scmp.eq.s32.totalorder (!%p2911_p7), %s2507_s12, 0 }
  0x3a   : > { %311 = sbr.rel (%p2911_p7) target bundleno = 864 (0x360), region = 52 }
  0x41   : > { %2431 = dma.done.wait (%p2912_p8), [#allocation5], 4096   ;;  %p2913_p2 = pmov %p2912_p8 }
  0x43   : > { %2433 = vsyncadd (%p2913_p2), [#allocation5], 4294963200  ;;  %p2914_p3 = pmov %p2913_p2 }
  0x44   : > { %p2915_p4 = pmov %p2913_p2 }
  0x45   : > { %2435 = dma.done.wait (%p2914_p3), [#allocation7], 8192  }
  0x46   : > { %2437 = vsyncadd (%p2915_p4), [#allocation7], 4294959104  ;;  %p351_p9 = scmp.lt.s32.totalorder %s2507_s12, 7  ;;  %p2916_p6 = scmp.ne.s32.totalorder %s2507_s12, 0 }
  0x47   : > { %v2200_v0 = vld [vmem:[%s2898_s1] sm:$0xff] (!%p2916_p6)  }
  0x48   : > { %s352_s16 = scalar_select %p351_p9, %s2507_s12, 7 }
  0x49   : > { %365 = sbr.rel (%p2916_p6) target bundleno = 80 (0x50), region = 64  ;;  %374 = vst [vmem:[#allocation2] sm:$0xff] (!%p2916_p6), %v2200_v0 }
  0x4a   : > { %s2038_s15 = sshll.u32 %s352_s16, 3  ;;  %s2039_s25 = sshll.u32 %s352_s16, 4 }
  0x4b   : > { %s2589_s27 = scalar_lea.vmem %s2897_s0, %s2038_s15  ;;  %s2594_s10 = scalar_lea.vmem %s2905_s8, %s2039_s25 }
  0x50 PF: > { %v2201_v1 = vld [vmem:[%s2900_s3] sm:$0xff]   ;;  %v2448_v2 = vmov 0.0   ;;  %v2203_v4 = vld [vmem:[%s2900_s3 + $0x8] sm:$0xff]   ;;  %vm2449_vm0 = vmmov 0   ;;  %v2205_v6 = vld [vmem:[%s2900_s3 + $0x10] sm:$0xff]   ;;  %p1939_p10 = scmp.ne.s32.totalorder %s2507_s12, 7 }
  0x51   : > { %2058 = vmatprep.subr.bf16.mxu1 %v2448_v2  ;;  %2078 = vmatprep.subr.bf16.mxu0 %v2448_v2  ;;  %v2202_v3 = vld [vmem:[%s2899_s2] sm:$0xff]   ;;  %v2204_v5 = vld [vmem:[%s2899_s2 + $0x8] sm:$0xff]   ;;  %v2206_v7 = vld [vmem:[%s2899_s2 + $0x10] sm:$0xff]   ;;  %v2450_v41 = vmov (!%p1939_p10), 0  }
  0x52   : > { %2059 = vmatpush3.bf16.msra.mxu1 %v2201_v1  ;;  %2074 = vmatprep.mubr.msk.bf16.mxu1 %vm2449_vm0, %v2448_v2  ;;  %v2207_v8 = vld [vmem:[%s2900_s3 + $0x18] sm:$0xff]   ;;  %v2209_v10 = vld [vmem:[%s2900_s3 + $0x20] sm:$0xff]   ;;  %v2211_v12 = vld [vmem:[%s2900_s3 + $0x28] sm:$0xff]  }
  0x53   : > { %2079 = vmatpush3.bf16.msra.mxu0 %v2202_v3  ;;  %2060 = vmatprep.subr.bf16.mxu1 %v2448_v2  ;;  %v2208_v9 = vld [vmem:[%s2899_s2 + $0x18] sm:$0xff]   ;;  %v2210_v11 = vld [vmem:[%s2899_s2 + $0x20] sm:$0xff]   ;;  %v2212_v13 = vld [vmem:[%s2899_s2 + $0x28] sm:$0xff]  }
  0x54   : > { %2080 = vmatprep.subr.bf16.mxu0 %v2448_v2  ;;  %2094 = vmatprep.mubr.msk.bf16.mxu0 %vm2449_vm0, %v2448_v2  ;;  %v2213_v14 = vld [vmem:[%s2900_s3 + $0x30] sm:$0xff]   ;;  %v2215_v16 = vld [vmem:[%s2900_s3 + $0x38] sm:$0xff]   ;;  %v377_v18 = vld [vmem:[#allocation2] sm:$0xff] }
  0x55   : > { %v2214_v15 = vld [vmem:[%s2899_s2 + $0x30] sm:$0xff]   ;;  %v2216_v17 = vld [vmem:[%s2899_s2 + $0x38] sm:$0xff]   ;;  %v2217_v19 = vld [vmem:[%s2589_s27] sm:$0xff]   ;;  %s1937_s27 = sshll.u32 %s2507_s12, 4 }
  0x56   : > { %2061 = vmatpush3.bf16.msra.mxu1 %v2203_v4  ;;  %s611_s14 = sshra.s32 %s1937_s27, 4  ;;  %v2226_v39 = vld [vmem:[#allocation4 + $0x4] ss:$16 sps:$4 sm:$0xff] (!%p1939_p10)   ;;  %v2228_v40 = vld [vmem:[#allocation4 + $0xc] ss:$16 sps:$4 sm:$0xff] (!%p1939_p10)  }
  0x57   : > { %2081 = vmatpush3.bf16.msra.mxu0 %v2204_v5  ;;  %2062 = vmatprep.subr.bf16.mxu1 %v2448_v2  ;;  %s1938_s17 = sshll.u32 %s611_s14, 3  ;;  %v2230_v42 = vld [vmem:[#allocation4] ss:$16 sps:$4 sm:$0xff] (!%p1939_p10)   ;;  %v2231_v43 = vld [vmem:[#allocation4 + $0x8] ss:$16 sps:$4 sm:$0xff] (!%p1939_p10)  }
  0x58   : > { %2082 = vmatprep.subr.bf16.mxu0 %v2448_v2  ;;  %s614_s18 = scalar_lea.vmem [#allocation3], %s1938_s17  ;;  %v2232_v44 = vld [vmem:[#allocation4 + $0x24] ss:$16 sps:$4 sm:$0xff] (!%p1939_p10)   ;;  %v2234_v45 = vld [vmem:[#allocation4 + $0x2c] ss:$16 sps:$4 sm:$0xff] (!%p1939_p10)  }
  0x59   : > { %v2236_v46 = vld [vmem:[#allocation4 + $0x20] ss:$16 sps:$4 sm:$0xff] (!%p1939_p10)   ;;  %v2237_v47 = vld [vmem:[#allocation4 + $0x28] ss:$16 sps:$4 sm:$0xff] (!%p1939_p10)   ;;  %v2238_v48 = vld [vmem:[#allocation4 + $0x44] ss:$16 sps:$4 sm:$0xff] (!%p1939_p10)  }
  0x5a   : > { %2063 = vmatpush3.bf16.msra.mxu1 %v2205_v6  ;;  %v2240_v49 = vld [vmem:[#allocation4 + $0x4c] ss:$16 sps:$4 sm:$0xff] (!%p1939_p10)   ;;  %v2242_v50 = vld [vmem:[#allocation4 + $0x40] ss:$16 sps:$4 sm:$0xff] (!%p1939_p10)   ;;  %v2243_v51 = vld [vmem:[#allocation4 + $0x48] ss:$16 sps:$4 sm:$0xff] (!%p1939_p10)  }
  0x5b   : > { %2083 = vmatpush3.bf16.msra.mxu0 %v2206_v7  ;;  %2064 = vmatprep.subr.bf16.mxu1 %v2448_v2  ;;  %v2244_v52 = vld [vmem:[#allocation4 + $0x64] ss:$16 sps:$4 sm:$0xff] (!%p1939_p10)   ;;  %v2246_v53 = vld [vmem:[#allocation4 + $0x6c] ss:$16 sps:$4 sm:$0xff] (!%p1939_p10)   ;;  %v2248_v54 = vld [vmem:[#allocation4 + $0x60] ss:$16 sps:$4 sm:$0xff] (!%p1939_p10)  }
  0x5c   : > { %2084 = vmatprep.subr.bf16.mxu0 %v2448_v2  ;;  %v2249_v55 = vld [vmem:[#allocation4 + $0x68] ss:$16 sps:$4 sm:$0xff] (!%p1939_p10)   ;;  %v2250_v56 = vld [vmem:[#allocation4 + $0x84] ss:$16 sps:$4 sm:$0xff] (!%p1939_p10)   ;;  %v2252_v57 = vld [vmem:[#allocation4 + $0x8c] ss:$16 sps:$4 sm:$0xff] (!%p1939_p10)  }
  0x5d   : > { %v2254_v58 = vld [vmem:[#allocation4 + $0x80] ss:$16 sps:$4 sm:$0xff] (!%p1939_p10)   ;;  %v2255_v59 = vld [vmem:[#allocation4 + $0x88] ss:$16 sps:$4 sm:$0xff] (!%p1939_p10)   ;;  %v2256_v60 = vld [vmem:[#allocation4 + $0xa4] ss:$16 sps:$4 sm:$0xff] (!%p1939_p10)  }
  0x5e   : > { %2065 = vmatpush3.bf16.msra.mxu1 %v2207_v8  ;;  %v2258_v61 = vld [vmem:[#allocation4 + $0xac] ss:$16 sps:$4 sm:$0xff] (!%p1939_p10)   ;;  %v2260_v62 = vld [vmem:[#allocation4 + $0xa0] ss:$16 sps:$4 sm:$0xff] (!%p1939_p10)   ;;  %v2261_v63 = vld [vmem:[#allocation4 + $0xa8] ss:$16 sps:$4 sm:$0xff] (!%p1939_p10)  }
  0x5f   : > { %2085 = vmatpush3.bf16.msra.mxu0 %v2208_v9  ;;  %2066 = vmatprep.subr.bf16.mxu1 %v2448_v2  ;;  %v2262_v0 = vld [vmem:[#allocation4 + $0xc4] ss:$16 sps:$4 sm:$0xff] (!%p1939_p10)   ;;  %v2264_v1 = vld [vmem:[#allocation4 + $0xcc] ss:$16 sps:$4 sm:$0xff] (!%p1939_p10)   ;;  %v2267_v3 = vld [vmem:[#allocation4 + $0xc8] ss:$16 sps:$4 sm:$0xff] (!%p1939_p10)  }
  0x60   : > { %2086 = vmatprep.subr.bf16.mxu0 %v2448_v2  ;;  %v2268_v4 = vld [vmem:[#allocation4 + $0xe4] ss:$16 sps:$4 sm:$0xff] (!%p1939_p10)   ;;  %v2270_v5 = vld [vmem:[#allocation4 + $0xec] ss:$16 sps:$4 sm:$0xff] (!%p1939_p10)   ;;  %v2272_v6 = vld [vmem:[#allocation4 + $0xe0] ss:$16 sps:$4 sm:$0xff] (!%p1939_p10)  }
  0x61   : > { %v2273_v7 = vld [vmem:[#allocation4 + $0xe8] ss:$16 sps:$4 sm:$0xff] (!%p1939_p10)   ;;  %v2276_v8 = vld [vmem:[#allocation6 + $0x4] ss:$8 sps:$4 sm:$0xff] (!%p1939_p10)  }
  0x62   : > { %2067 = vmatpush3.bf16.msra.mxu1 %v2209_v10  ;;  %v2279_v9 = vld [vmem:[#allocation6 + $0x104] ss:$8 sps:$4 sm:$0xff] (!%p1939_p10)  }
  0x63   : > { %2087 = vmatpush3.bf16.msra.mxu0 %v2210_v11  ;;  %2068 = vmatprep.subr.bf16.mxu1 %v2448_v2  ;;  %v2274_v11 = vld [vmem:[#allocation6] ss:$8 sps:$4 sm:$0xff] (!%p1939_p10)  }
  0x64   : > { %2088 = vmatprep.subr.bf16.mxu0 %v2448_v2 }
  0x66   : > { %2069 = vmatpush3.bf16.msra.mxu1 %v2211_v12  ;;  %v2277_v12 = vld [vmem:[#allocation6 + $0x100] ss:$8 sps:$4 sm:$0xff] (!%p1939_p10)  }
  0x67   : > { %2089 = vmatpush3.bf16.msra.mxu0 %v2212_v13  ;;  %2070 = vmatprep.subr.bf16.mxu1 %v2448_v2  ;;  %v2282_v13 = vld [vmem:[#allocation6 + $0x14] ss:$8 sps:$4 sm:$0xff] (!%p1939_p10)  }
  0x68   : > { %2090 = vmatprep.subr.bf16.mxu0 %v2448_v2 }
  0x6a   : > { %2071 = vmatpush3.bf16.msra.mxu1 %v2213_v14  ;;  %v2285_v14 = vld [vmem:[#allocation6 + $0x114] ss:$8 sps:$4 sm:$0xff] (!%p1939_p10)  }
  0x6b   : > { %2091 = vmatpush3.bf16.msra.mxu0 %v2214_v15  ;;  %2072 = vmatprep.subr.bf16.mxu1 %v2448_v2  ;;  %v2280_v15 = vld [vmem:[#allocation6 + $0x10] ss:$8 sps:$4 sm:$0xff] (!%p1939_p10)  }
  0x6c   : > { %2092 = vmatprep.subr.bf16.mxu0 %v2448_v2  ;;  %v2266_v2 = vld [vmem:[#allocation4 + $0xc0] ss:$16 sps:$4 sm:$0xff] (!%p1939_p10)  }
  0x6e   : > { %2073 = vmatpush3.bf16.msra.mxu1 %v2215_v16  ;;  %v2283_v16 = vld [vmem:[#allocation6 + $0x110] ss:$8 sps:$4 sm:$0xff] (!%p1939_p10)  }
  0x6f   : > { %2093 = vmatpush3.bf16.msra.mxu0 %v2216_v17  ;;  %955 = vmatprep.subr.bf16.mxu1 (!%p1939_p10), %v2228_v40  ;;  %v2288_v17 = vld [vmem:[#allocation6 + $0x24] ss:$8 sps:$4 sm:$0xff] (!%p1939_p10)   ;;  %v2318_v40 = vld [vmem:[#allocation6 + $0x74] ss:$8 sps:$4 sm:$0xff] (!%p1939_p10)  }
  0x70   : > { %842 = vmatprep.subr.bf16.mxu0 (!%p1939_p10), %v2226_v39  ;;  %v2313_v39 = vld [vmem:[#allocation6 + $0x160] ss:$8 sps:$4 sm:$0xff] (!%p1939_p10)  }
  0x71   : > { %2075 = vmatmul.mubr.bf16.vlgmr.msra.gmra.mrb[0].mxu1 %v377_v18  ;;  %v2291_v18 = vld [vmem:[#allocation6 + $0x124] ss:$8 sps:$4 sm:$0xff] (!%p1939_p10)  }
  0x72   : > { %2095 = vmatmul.mubr.bf16.vlgmr.msra.gmra.mrb[0].mxu0 %v2217_v19  ;;  %987 = vmatprep.mubr.bf16.mxu1 (!%p1939_p10), %v2450_v41 }
  0x73   : > { %874 = vmatprep.mubr.bf16.mxu0 (!%p1939_p10), %v2450_v41  ;;  %843 = vmatpush1.bf16.msra.mxu0 (!%p1939_p10), %v2230_v42  ;;  %v2321_v42 = vld [vmem:[#allocation6 + $0x174] ss:$8 sps:$4 sm:$0xff] (!%p1939_p10)  }
  0x74   : > { %956 = vmatpush1.bf16.msra.mxu1 (!%p1939_p10), %v2231_v43  ;;  %844 = vmatprep.subr.bf16.mxu0 (!%p1939_p10), %v2232_v44  ;;  %v2316_v43 = vld [vmem:[#allocation6 + $0x70] ss:$8 sps:$4 sm:$0xff] (!%p1939_p10)  }
  0x75   : > { %957 = vmatprep.subr.bf16.mxu1 (!%p1939_p10), %v2234_v45  ;;  %v2319_v44 = vld [vmem:[#allocation6 + $0x170] ss:$8 sps:$4 sm:$0xff] (!%p1939_p10)   ;;  %v2324_v45 = vld [vmem:[#allocation6 + $0x84] ss:$8 sps:$4 sm:$0xff] (!%p1939_p10)  }
  0x77   : > { %845 = vmatpush1.bf16.msra.mxu0 (!%p1939_p10), %v2236_v46  ;;  %v2327_v46 = vld [vmem:[#allocation6 + $0x184] ss:$8 sps:$4 sm:$0xff] (!%p1939_p10)  }
  0x78   : > { %958 = vmatpush1.bf16.msra.mxu1 (!%p1939_p10), %v2237_v47  ;;  %846 = vmatprep.subr.bf16.mxu0 (!%p1939_p10), %v2238_v48  ;;  %v2322_v48 = vld [vmem:[#allocation6 + $0x80] ss:$8 sps:$4 sm:$0xff] (!%p1939_p10)  }
  0x79   : > { %959 = vmatprep.subr.bf16.mxu1 (!%p1939_p10), %v2240_v49  ;;  %v2325_v49 = vld [vmem:[#allocation6 + $0x180] ss:$8 sps:$4 sm:$0xff] (!%p1939_p10)  }
  0x7b   : > { %847 = vmatpush1.bf16.msra.mxu0 (!%p1939_p10), %v2242_v50  ;;  %v2330_v50 = vld [vmem:[#allocation6 + $0x94] ss:$8 sps:$4 sm:$0xff] (!%p1939_p10)  }
  0x7c   : > { %960 = vmatpush1.bf16.msra.mxu1 (!%p1939_p10), %v2243_v51  ;;  %848 = vmatprep.subr.bf16.mxu0 (!%p1939_p10), %v2244_v52  ;;  %v2333_v51 = vld [vmem:[#allocation6 + $0x194] ss:$8 sps:$4 sm:$0xff] (!%p1939_p10)   ;;  %v2328_v52 = vld [vmem:[#allocation6 + $0x90] ss:$8 sps:$4 sm:$0xff] (!%p1939_p10)  }
  0x7d   : > { %961 = vmatprep.subr.bf16.mxu1 (!%p1939_p10), %v2246_v53  ;;  %v2331_v53 = vld [vmem:[#allocation6 + $0x190] ss:$8 sps:$4 sm:$0xff] (!%p1939_p10)  }
  0x7f   : > { %849 = vmatpush1.bf16.msra.mxu0 (!%p1939_p10), %v2248_v54  ;;  %v2336_v54 = vld [vmem:[#allocation6 + $0xa4] ss:$8 sps:$4 sm:$0xff] (!%p1939_p10)  }
  0x80   : > { %962 = vmatpush1.bf16.msra.mxu1 (!%p1939_p10), %v2249_v55  ;;  %850 = vmatprep.subr.bf16.mxu0 (!%p1939_p10), %v2250_v56  ;;  %v2339_v55 = vld [vmem:[#allocation6 + $0x1a4] ss:$8 sps:$4 sm:$0xff] (!%p1939_p10)  }
  0x81   : > { %963 = vmatprep.subr.bf16.mxu1 (!%p1939_p10), %v2252_v57  ;;  %v2334_v57 = vld [vmem:[#allocation6 + $0xa0] ss:$8 sps:$4 sm:$0xff] (!%p1939_p10)  }
  0x83   : > { %851 = vmatpush1.bf16.msra.mxu0 (!%p1939_p10), %v2254_v58  ;;  %v2337_v58 = vld [vmem:[#allocation6 + $0x1a0] ss:$8 sps:$4 sm:$0xff] (!%p1939_p10)  }
  0x84   : > { %964 = vmatpush1.bf16.msra.mxu1 (!%p1939_p10), %v2255_v59  ;;  %852 = vmatprep.subr.bf16.mxu0 (!%p1939_p10), %v2256_v60  ;;  %v2342_v59 = vld [vmem:[#allocation6 + $0xb4] ss:$8 sps:$4 sm:$0xff] (!%p1939_p10)  }
  0x85   : > { %965 = vmatprep.subr.bf16.mxu1 (!%p1939_p10), %v2258_v61  ;;  %v2345_v60 = vld [vmem:[#allocation6 + $0x1b4] ss:$8 sps:$4 sm:$0xff] (!%p1939_p10)   ;;  %v2340_v61 = vld [vmem:[#allocation6 + $0xb0] ss:$8 sps:$4 sm:$0xff] (!%p1939_p10)  }
  0x87   : > { %853 = vmatpush1.bf16.msra.mxu0 (!%p1939_p10), %v2260_v62  ;;  %v2343_v62 = vld [vmem:[#allocation6 + $0x1b0] ss:$8 sps:$4 sm:$0xff] (!%p1939_p10)  }
  0x88   : > { %966 = vmatpush1.bf16.msra.mxu1 (!%p1939_p10), %v2261_v63  ;;  %854 = vmatprep.subr.bf16.mxu0 (!%p1939_p10), %v2262_v0  ;;  %v2348_v63 = vld [vmem:[#allocation6 + $0xc4] ss:$8 sps:$4 sm:$0xff] (!%p1939_p10)  }
  0x89   : > { %967 = vmatprep.subr.bf16.mxu1 (!%p1939_p10), %v2264_v1  ;;  %v2351_v0 = vld [vmem:[#allocation6 + $0x1c4] ss:$8 sps:$4 sm:$0xff] (!%p1939_p10)  }
  0x8b   : > { %855 = vmatpush1.bf16.msra.mxu0 (!%p1939_p10), %v2266_v2  ;;  %v2346_v2 = vld [vmem:[#allocation6 + $0xc0] ss:$8 sps:$4 sm:$0xff] (!%p1939_p10)  }
  0x8c   : > { %968 = vmatpush1.bf16.msra.mxu1 (!%p1939_p10), %v2267_v3  ;;  %856 = vmatprep.subr.bf16.mxu0 (!%p1939_p10), %v2268_v4  ;;  %v2349_v3 = vld [vmem:[#allocation6 + $0x1c0] ss:$8 sps:$4 sm:$0xff] (!%p1939_p10)   ;;  %v2354_v4 = vld [vmem:[#allocation6 + $0xd4] ss:$8 sps:$4 sm:$0xff] (!%p1939_p10)  }
  0x8d   : > { %969 = vmatprep.subr.bf16.mxu1 (!%p1939_p10), %v2270_v5  ;;  %v2357_v5 = vld [vmem:[#allocation6 + $0x1d4] ss:$8 sps:$4 sm:$0xff] (!%p1939_p10)  }
  0x8f   : > { %857 = vmatpush1.bf16.msra.mxu0 (!%p1939_p10), %v2272_v6  ;;  %v2352_v6 = vld [vmem:[#allocation6 + $0xd0] ss:$8 sps:$4 sm:$0xff] (!%p1939_p10)  }
  0x90   : > { %970 = vmatpush1.bf16.msra.mxu1 (!%p1939_p10), %v2273_v7  ;;  %1673 = vmatprep.subr.bf16.mxu0 (!%p1939_p10), %v2279_v9  ;;  %v2355_v7 = vld [vmem:[#allocation6 + $0x1d0] ss:$8 sps:$4 sm:$0xff] (!%p1939_p10)   ;;  %v2360_v9 = vld [vmem:[#allocation6 + $0xe4] ss:$8 sps:$4 sm:$0xff] (!%p1939_p10)  }
  0x91   : > { %1560 = vmatprep.subr.bf16.mxu1 (!%p1939_p10), %v2276_v8 }
 0x144   : > { %v492_v20 = vpop.f32.mrb[0].mxu1 }
 0x145   : > { %v587_v21 = vpop.f32.mrb[0].mxu0  ;;  %v2076_v22 = vpop.f32.mrb[1].mxu1 }
 0x146   : > { %v588_v23 = vadd.f32 %v587_v21, %v492_v20  ;;  %v2096_v24 = vpop.f32.mrb[1].mxu0  ;;  %v495_v25 = vpop.f32.mrb[2].mxu1  ;;  %v2286_v20 = vld [vmem:[#allocation6 + $0x20] ss:$8 sps:$4 sm:$0xff] (!%p1939_p10)   ;;  %v2294_v22 = vld [vmem:[#allocation6 + $0x34] ss:$8 sps:$4 sm:$0xff] (!%p1939_p10)  }
 0x147   : > { %v590_v26 = vpop.f32.mrb[2].mxu0  ;;  %v2077_v27 = vpop.f32.mrb[3].mxu1  ;;  %v2289_v21 = vld [vmem:[#allocation6 + $0x120] ss:$8 sps:$4 sm:$0xff] (!%p1939_p10)   ;;  %v2292_v24 = vld [vmem:[#allocation6 + $0x30] ss:$8 sps:$4 sm:$0xff] (!%p1939_p10)  }
 0x148   : > { %v1935_v28 = vmul.f32 -1.442695, %v588_v23  ;;  %v591_v29 = vadd.f32 %v590_v26, %v495_v25  ;;  %v2097_v30 = vpop.f32.mrb[3].mxu0  ;;  %v2297_v23 = vld [vmem:[#allocation6 + $0x134] ss:$8 sps:$4 sm:$0xff] (!%p1939_p10)  }
 0x149   : > { %v2295_v25 = vld [vmem:[#allocation6 + $0x130] ss:$8 sps:$4 sm:$0xff] (!%p1939_p10)   ;;  %v2300_v26 = vld [vmem:[#allocation6 + $0x44] ss:$8 sps:$4 sm:$0xff] (!%p1939_p10)   ;;  %v2301_v30 = vld [vmem:[#allocation6 + $0x140] ss:$8 sps:$4 sm:$0xff] (!%p1939_p10)  }
 0x14a   : > { %2218 = vpow2.f32 %v1935_v28  ;;  %v1936_v31 = vmul.f32 -1.442695, %v591_v29  ;;  %v2303_v27 = vld [vmem:[#allocation6 + $0x144] ss:$8 sps:$4 sm:$0xff] (!%p1939_p10)   ;;  %v2298_v29 = vld [vmem:[#allocation6 + $0x40] ss:$8 sps:$4 sm:$0xff] (!%p1939_p10)  }
 0x14c   : > { %2220 = vpow2.f32 %v1936_v31  ;;  %v2306_v31 = vld [vmem:[#allocation6 + $0x54] ss:$8 sps:$4 sm:$0xff] (!%p1939_p10)  }
 0x154   : > { %v2219_v32 = vpop.eup %2218 }
 0x155   : > { %v600_v33 = vadd.f32 1.0, %v2219_v32  ;;  %v2309_v32 = vld [vmem:[#allocation6 + $0x154] ss:$8 sps:$4 sm:$0xff] (!%p1939_p10)  }
 0x156   : > { %v2221_v34 = vpop.eup %2220 }
 0x157   : > { %2222 = vrcp.f32 %v600_v33  ;;  %v601_v35 = vadd.f32 1.0, %v2221_v34  ;;  %v2304_v33 = vld [vmem:[#allocation6 + $0x50] ss:$8 sps:$4 sm:$0xff] (!%p1939_p10)  }
 0x158   : > { %v2307_v34 = vld [vmem:[#allocation6 + $0x150] ss:$8 sps:$4 sm:$0xff] (!%p1939_p10)  }
 0x159   : > { %2224 = vrcp.f32 %v601_v35  ;;  %v2312_v35 = vld [vmem:[#allocation6 + $0x64] ss:$8 sps:$4 sm:$0xff] (!%p1939_p10)  }
 0x160   : > { %619 = sbr.rel (%p1939_p10) target bundleno = 864 (0x360), region = 68 }
 0x161   : > { %v2223_v36 = vpop.eup %2222 }
 0x162   : > { %606 = vst [vmem:[%s2594_s10] sm:$0xff] %v2223_v36 }
 0x163   : > { %v2225_v37 = vpop.eup %2224 }
 0x164   : > { %607 = vst [vmem:[%s2594_s10 + $0x8] sm:$0xff] %v2225_v37  ;;  %v608_v38 = vpack.c.bf16 %v2225_v37, %v2223_v36  ;;  %v2315_v36 = vld [vmem:[#allocation6 + $0x164] ss:$8 sps:$4 sm:$0xff] (!%p1939_p10)  }
 0x166   : > { %609 = vst [vmem:[#allocation2] sm:$0xff] %v608_v38  ;;  %615 = vst [vmem:[%s614_s18] sm:$0xff] %v608_v38  ;;  %v2310_v38 = vld [vmem:[#allocation6 + $0x60] ss:$8 sps:$4 sm:$0xff] (!%p1939_p10)  }
 0x16d   : > { %v620_v10 = vld [vmem:[#allocation3] sm:$0xff]  ;;  %v621_v19 = vld [vmem:[#allocation3 + $0x8] sm:$0xff]  ;;  %v622_v28 = vld [vmem:[#allocation3 + $0x10] sm:$0xff] }
 0x16e   : > { %875 = vmatmul.mubr.bf16.vlgmr.msra.gmra.mrb[0].mxu0 %v620_v10  ;;  %988 = vmatmul.mubr.bf16.vlgmr.msra.gmra.mrb[0].mxu1 %v620_v10  ;;  %v623_v37 = vld [vmem:[#allocation3 + $0x18] sm:$0xff]  ;;  %v624_v47 = vld [vmem:[#allocation3 + $0x20] sm:$0xff]  ;;  %v625_v56 = vld [vmem:[#allocation3 + $0x28] sm:$0xff] }
 0x16f   : > { %884 = vmatprep.mubr.bf16.mxu0 %v2450_v41  ;;  %997 = vmatprep.mubr.bf16.mxu1 %v2450_v41  ;;  %v626_v1 = vld [vmem:[#allocation3 + $0x30] sm:$0xff]  ;;  %v627_v8 = vld [vmem:[#allocation3 + $0x38] sm:$0xff]  ;;  %v2363_v10 = vld [vmem:[#allocation6 + $0x1e4] ss:$8 sps:$4 sm:$0xff]  }
 0x170   : > { %1561 = vmatpush1.bf16.msra.mxu1 %v2274_v11  ;;  %1674 = vmatpush1.bf16.msra.mxu0 %v2277_v12  ;;  %v2358_v11 = vld [vmem:[#allocation6 + $0xe0] ss:$8 sps:$4 sm:$0xff]  }
 0x171   : > { %1562 = vmatprep.subr.bf16.mxu1 %v2282_v13  ;;  %1675 = vmatprep.subr.bf16.mxu0 %v2285_v14  ;;  %v2361_v12 = vld [vmem:[#allocation6 + $0x1e0] ss:$8 sps:$4 sm:$0xff]   ;;  %v2369_v13 = vld [vmem:[#allocation6 + $0x1f4] ss:$8 sps:$4 sm:$0xff]   ;;  %v2364_v14 = vld [vmem:[#allocation6 + $0xf0] ss:$8 sps:$4 sm:$0xff]  }
 0x174   : > { %1563 = vmatpush1.bf16.msra.mxu1 %v2280_v15  ;;  %1676 = vmatpush1.bf16.msra.mxu0 %v2283_v16  ;;  %v2367_v15 = vld [vmem:[#allocation6 + $0x1f0] ss:$8 sps:$4 sm:$0xff]   ;;  %v662_v16 = vlaneseq }
 0x175   : > { %1564 = vmatprep.subr.bf16.mxu1 %v2288_v17  ;;  %1677 = vmatprep.subr.bf16.mxu0 %v2291_v18 }
 0x176   : > { %885 = vmatmul.mubr.bf16.gmra.mrb[4].mxu0 %v621_v19  ;;  %998 = vmatmul.mubr.bf16.gmra.mrb[4].mxu1 %v621_v19  ;;  %v2670_v17 = vshrl.u32 %v662_v16, 7 }
 0x177   : > { %894 = vmatprep.mubr.bf16.mxu0 %v2450_v41  ;;  %1007 = vmatprep.mubr.bf16.mxu1 %v2450_v41 }
 0x178   : > { %1565 = vmatpush1.bf16.msra.mxu1 %v2286_v20  ;;  %1678 = vmatpush1.bf16.msra.mxu0 %v2289_v21  ;;  %v664_v18 = vsub.s32 0, %v2670_v17  ;;  %v672_v19 = vsub.s32 2, %v2670_v17  ;;  %v660_v20 = vld [vmem:[%s2902_s5] sm:$0xf]  ;;  %v668_v21 = vsub.s32 1, %v2670_v17 }
 0x179   : > { %1566 = vmatprep.subr.bf16.mxu1 %v2294_v22  ;;  %1679 = vmatprep.subr.bf16.mxu0 %v2297_v23  ;;  %v676_v22 = vsub.s32 3, %v2670_v17 }
 0x17a   : > { %v2681_v23 = vrot.slane %v660_v20, %v664_v18 }
 0x17c   : > { %1567 = vmatpush1.bf16.msra.mxu1 %v2292_v24  ;;  %1680 = vmatpush1.bf16.msra.mxu0 %v2295_v25  ;;  %v2683_v24 = vrot.slane %v660_v20, %v672_v19  ;;  %v2687_v25 = vrot.slane %v660_v20, %v668_v21 }
 0x17d   : > { %1568 = vmatprep.subr.bf16.mxu1 %v2300_v26  ;;  %1681 = vmatprep.subr.bf16.mxu0 %v2303_v27  ;;  %v2689_v26 = vrot.slane %v660_v20, %v676_v22 }
 0x17e   : > { %895 = vmatmul.mubr.bf16.gmra.mrb[8].mxu0 %v622_v28  ;;  %1008 = vmatmul.mubr.bf16.gmra.mrb[8].mxu1 %v622_v28 }
 0x17f   : > { %904 = vmatprep.mubr.bf16.mxu0 %v2450_v41  ;;  %1017 = vmatprep.mubr.bf16.mxu1 %v2450_v41 }
 0x180   : > { %1569 = vmatpush1.bf16.msra.mxu1 %v2298_v29  ;;  %1682 = vmatpush1.bf16.msra.mxu0 %v2301_v30 }
 0x181   : > { %1570 = vmatprep.subr.bf16.mxu1 %v2306_v31  ;;  %1683 = vmatprep.subr.bf16.mxu0 %v2309_v32 }
 0x184   : > { %1571 = vmatpush1.bf16.msra.mxu1 %v2304_v33  ;;  %1684 = vmatpush1.bf16.msra.mxu0 %v2307_v34 }
 0x185   : > { %1572 = vmatprep.subr.bf16.mxu1 %v2312_v35  ;;  %1685 = vmatprep.subr.bf16.mxu0 %v2315_v36 }
 0x186   : > { %905 = vmatmul.mubr.bf16.gmra.mrb[12].mxu0 %v623_v37  ;;  %1018 = vmatmul.mubr.bf16.gmra.mrb[12].mxu1 %v623_v37 }
 0x187   : > { %914 = vmatprep.mubr.bf16.mxu0 %v2450_v41  ;;  %1027 = vmatprep.mubr.bf16.mxu1 %v2450_v41 }
 0x188   : > { %1573 = vmatpush1.bf16.msra.mxu1 %v2310_v38  ;;  %1686 = vmatpush1.bf16.msra.mxu0 %v2313_v39 }
 0x189   : > { %1574 = vmatprep.subr.bf16.mxu1 %v2318_v40  ;;  %1687 = vmatprep.subr.bf16.mxu0 %v2321_v42 }
 0x18c   : > { %1575 = vmatpush1.bf16.msra.mxu1 %v2316_v43  ;;  %1688 = vmatpush1.bf16.msra.mxu0 %v2319_v44 }
 0x18d   : > { %1576 = vmatprep.subr.bf16.mxu1 %v2324_v45  ;;  %1689 = vmatprep.subr.bf16.mxu0 %v2327_v46 }
 0x18e   : > { %915 = vmatmul.mubr.bf16.gmra.mrb[16].mxu0 %v624_v47  ;;  %1028 = vmatmul.mubr.bf16.gmra.mrb[16].mxu1 %v624_v47 }
 0x18f   : > { %924 = vmatprep.mubr.bf16.mxu0 %v2450_v41  ;;  %1037 = vmatprep.mubr.bf16.mxu1 %v2450_v41 }
 0x190   : > { %1577 = vmatpush1.bf16.msra.mxu1 %v2322_v48  ;;  %1690 = vmatpush1.bf16.msra.mxu0 %v2325_v49 }
 0x191   : > { %1578 = vmatprep.subr.bf16.mxu1 %v2330_v50  ;;  %1691 = vmatprep.subr.bf16.mxu0 %v2333_v51 }
 0x194   : > { %1579 = vmatpush1.bf16.msra.mxu1 %v2328_v52  ;;  %1692 = vmatpush1.bf16.msra.mxu0 %v2331_v53 }
 0x195   : > { %1580 = vmatprep.subr.bf16.mxu1 %v2336_v54  ;;  %1693 = vmatprep.subr.bf16.mxu0 %v2339_v55 }
 0x196   : > { %925 = vmatmul.mubr.bf16.gmra.mrb[20].mxu0 %v625_v56  ;;  %1038 = vmatmul.mubr.bf16.gmra.mrb[20].mxu1 %v625_v56 }
 0x197   : > { %934 = vmatprep.mubr.bf16.mxu0 %v2450_v41  ;;  %1047 = vmatprep.mubr.bf16.mxu1 %v2450_v41 }
 0x198   : > { %1581 = vmatpush1.bf16.msra.mxu1 %v2334_v57  ;;  %1694 = vmatpush1.bf16.msra.mxu0 %v2337_v58 }
 0x199   : > { %1582 = vmatprep.subr.bf16.mxu1 %v2342_v59  ;;  %1695 = vmatprep.subr.bf16.mxu0 %v2345_v60 }
 0x19c   : > { %1583 = vmatpush1.bf16.msra.mxu1 %v2340_v61  ;;  %1696 = vmatpush1.bf16.msra.mxu0 %v2343_v62 }
 0x19d   : > { %1584 = vmatprep.subr.bf16.mxu1 %v2348_v63  ;;  %1697 = vmatprep.subr.bf16.mxu0 %v2351_v0 }
 0x19e   : > { %935 = vmatmul.mubr.bf16.gmra.mrb[24].mxu0 %v626_v1  ;;  %1048 = vmatmul.mubr.bf16.gmra.mrb[24].mxu1 %v626_v1 }
 0x19f   : > { %944 = vmatprep.mubr.bf16.mxu0 %v2450_v41  ;;  %1057 = vmatprep.mubr.bf16.mxu1 %v2450_v41  ;;  %v2366_v41 = vld [vmem:[#allocation6 + $0xf4] ss:$8 sps:$4 sm:$0xff]  }
 0x1a0   : > { %1585 = vmatpush1.bf16.msra.mxu1 %v2346_v2  ;;  %1698 = vmatpush1.bf16.msra.mxu0 %v2349_v3 }
 0x1a1   : > { %1586 = vmatprep.subr.bf16.mxu1 %v2354_v4  ;;  %1699 = vmatprep.subr.bf16.mxu0 %v2357_v5 }
 0x1a4   : > { %1587 = vmatpush1.bf16.msra.mxu1 %v2352_v6  ;;  %1700 = vmatpush1.bf16.msra.mxu0 %v2355_v7 }
 0x1a5   : > { %1588 = vmatprep.subr.bf16.mxu1 %v2360_v9  ;;  %1701 = vmatprep.subr.bf16.mxu0 %v2363_v10 }
 0x1a6   : > { %945 = vmatmul.mubr.bf16.gmra.mrb[28].mxu0 %v627_v8  ;;  %1058 = vmatmul.mubr.bf16.gmra.mrb[28].mxu1 %v627_v8 }
 0x1a8   : > { %1589 = vmatpush1.bf16.msra.mxu1 %v2358_v11  ;;  %1702 = vmatpush1.bf16.msra.mxu0 %v2361_v12 }
 0x1a9   : > { %1590 = vmatprep.subr.bf16.mxu1 %v2366_v41  ;;  %1703 = vmatprep.subr.bf16.mxu0 %v2369_v13 }
 0x1ac   : > { %1591 = vmatpush1.bf16.msra.mxu1 %v2364_v14  ;;  %1704 = vmatpush1.bf16.msra.mxu0 %v2367_v15 }
 0x241   : > { %v876_v27 = vpop.f32.mrb[0].mxu0  ;;  %v989_v28 = vpop.f32.mrb[0].mxu1 }
 0x242   : > { %v877_v29 = vadd.f32 %v876_v27, %v2681_v23  ;;  %v990_v30 = vadd.f32 %v989_v28, %v2683_v24  ;;  %v878_v31 = vpop.f32.mrb[1].mxu0  ;;  %v991_v32 = vpop.f32.mrb[1].mxu1 }
 0x243   : > { %v879_v33 = vadd.f32 %v878_v31, %v2687_v25  ;;  %v992_v34 = vadd.f32 %v991_v32, %v2689_v26  ;;  %v880_v35 = vpop.f32.mrb[2].mxu0  ;;  %v993_v36 = vpop.f32.mrb[2].mxu1 }
 0x244   : > { %v1070_v37 = vmax.f32 %v990_v30, 0.0  ;;  %v881_v38 = vadd.f32 %v880_v35, %v2681_v23  ;;  %v994_v39 = vadd.f32 %v993_v36, %v2683_v24  ;;  %v882_v40 = vpop.f32.mrb[3].mxu0  ;;  %v995_v42 = vpop.f32.mrb[3].mxu1  ;;  %v1068_v46 = vmax.f32 %v877_v29, 0.0 }
 0x245   : > { %v1071_v43 = vmax.f32 %v992_v34, 0.0  ;;  %v883_v44 = vadd.f32 %v882_v40, %v2687_v25  ;;  %v996_v45 = vadd.f32 %v995_v42, %v2689_v26  ;;  %v1069_v49 = vmax.f32 %v879_v33, 0.0 }
 0x246   : > { %v1072_v47 = vmax.f32 %v881_v38, 0.0  ;;  %v1074_v48 = vmax.f32 %v994_v39, 0.0 }
 0x247   : > { %v1073_v50 = vmax.f32 %v883_v44, 0.0  ;;  %v1075_v51 = vmax.f32 %v996_v45, 0.0 }
 0x248   : > { %v1132_v52 = vpack.c.bf16 %v1072_v47, %v1068_v46  ;;  %v1134_v53 = vpack.c.bf16 %v1074_v48, %v1070_v37 }
 0x249   : > { %v1133_v54 = vpack.c.bf16 %v1073_v50, %v1069_v49  ;;  %v1135_v55 = vpack.c.bf16 %v1075_v51, %v1071_v43  ;;  %v886_v56 = vpop.f32.mrb[4].mxu0  ;;  %v999_v57 = vpop.f32.mrb[4].mxu1 }
 0x24a   : > { %v887_v58 = vadd.f32 %v886_v56, %v2681_v23  ;;  %v1000_v59 = vadd.f32 %v999_v57, %v2683_v24  ;;  %v888_v60 = vpop.f32.mrb[5].mxu0  ;;  %v1001_v61 = vpop.f32.mrb[5].mxu1 }
 0x24b   : > { %v889_v62 = vadd.f32 %v888_v60, %v2687_v25  ;;  %v1002_v63 = vadd.f32 %v1001_v61, %v2689_v26  ;;  %v890_v0 = vpop.f32.mrb[6].mxu0  ;;  %v1003_v1 = vpop.f32.mrb[6].mxu1  ;;  %1592 = vmatprep.mubr.bf16.mxu1 %v1133_v54  ;;  %1705 = vmatprep.mubr.bf16.mxu0 %v1135_v55 }
 0x24c   : > { %v1078_v2 = vmax.f32 %v1000_v59, 0.0  ;;  %v891_v3 = vadd.f32 %v890_v0, %v2681_v23  ;;  %v1004_v4 = vadd.f32 %v1003_v1, %v2683_v24  ;;  %v892_v5 = vpop.f32.mrb[7].mxu0  ;;  %v1005_v6 = vpop.f32.mrb[7].mxu1  ;;  %1593 = vmatmul.mubr.bf16.vlgmr.msra.gmra.mrb[32].mxu1 %v1132_v52  ;;  %1706 = vmatmul.mubr.bf16.vlgmr.msra.gmra.mrb[32].mxu0 %v1134_v53  ;;  %v1076_v10 = vmax.f32 %v887_v58, 0.0 }
 0x24d   : > { %v1079_v7 = vmax.f32 %v1002_v63, 0.0  ;;  %v893_v8 = vadd.f32 %v892_v5, %v2687_v25  ;;  %v1006_v9 = vadd.f32 %v1005_v6, %v2689_v26  ;;  %v1077_v41 = vmax.f32 %v889_v62, 0.0 }
 0x24e   : > { %v1080_v11 = vmax.f32 %v891_v3, 0.0  ;;  %v1082_v12 = vmax.f32 %v1004_v4, 0.0 }
 0x24f   : > { %v1081_v13 = vmax.f32 %v893_v8, 0.0  ;;  %v1083_v14 = vmax.f32 %v1006_v9, 0.0 }
 0x250   : > { %v1136_v15 = vpack.c.bf16 %v1080_v11, %v1076_v10  ;;  %v1138_v16 = vpack.c.bf16 %v1082_v12, %v1078_v2 }
 0x251   : > { %v1137_v19 = vpack.c.bf16 %v1081_v13, %v1077_v41  ;;  %v1139_v20 = vpack.c.bf16 %v1083_v14, %v1079_v7  ;;  %v896_v22 = vpop.f32.mrb[8].mxu0  ;;  %v1009_v27 = vpop.f32.mrb[8].mxu1 }
 0x252   : > { %v897_v28 = vadd.f32 %v896_v22, %v2681_v23  ;;  %v1010_v29 = vadd.f32 %v1009_v27, %v2683_v24  ;;  %v898_v30 = vpop.f32.mrb[9].mxu0  ;;  %v1011_v31 = vpop.f32.mrb[9].mxu1 }
 0x253   : > { %v899_v32 = vadd.f32 %v898_v30, %v2687_v25  ;;  %v1012_v33 = vadd.f32 %v1011_v31, %v2689_v26  ;;  %v900_v34 = vpop.f32.mrb[10].mxu0  ;;  %v1013_v35 = vpop.f32.mrb[10].mxu1  ;;  %1602 = vmatprep.mubr.bf16.mxu1 %v1137_v19  ;;  %1715 = vmatprep.mubr.bf16.mxu0 %v1139_v20 }
 0x254   : > { %v1086_v36 = vmax.f32 %v1010_v29, 0.0  ;;  %v901_v37 = vadd.f32 %v900_v34, %v2681_v23  ;;  %v1014_v38 = vadd.f32 %v1013_v35, %v2683_v24  ;;  %v902_v39 = vpop.f32.mrb[11].mxu0  ;;  %v1015_v40 = vpop.f32.mrb[11].mxu1  ;;  %1603 = vmatmul.mubr.bf16.gmra.mrb[36].mxu1 %v1136_v15  ;;  %1716 = vmatmul.mubr.bf16.gmra.mrb[36].mxu0 %v1138_v16  ;;  %v1084_v45 = vmax.f32 %v897_v28, 0.0 }
 0x255   : > { %v1087_v42 = vmax.f32 %v1012_v33, 0.0  ;;  %v903_v43 = vadd.f32 %v902_v39, %v2687_v25  ;;  %v1016_v44 = vadd.f32 %v1015_v40, %v2689_v26  ;;  %v1085_v48 = vmax.f32 %v899_v32, 0.0 }
 0x256   : > { %v1088_v46 = vmax.f32 %v901_v37, 0.0  ;;  %v1090_v47 = vmax.f32 %v1014_v38, 0.0 }
 0x257   : > { %v1089_v49 = vmax.f32 %v903_v43, 0.0  ;;  %v1091_v50 = vmax.f32 %v1016_v44, 0.0 }
 0x258   : > { %v1140_v51 = vpack.c.bf16 %v1088_v46, %v1084_v45  ;;  %v1142_v52 = vpack.c.bf16 %v1090_v47, %v1086_v36 }
 0x259   : > { %v1141_v53 = vpack.c.bf16 %v1089_v49, %v1085_v48  ;;  %v1143_v54 = vpack.c.bf16 %v1091_v50, %v1087_v42  ;;  %v906_v55 = vpop.f32.mrb[12].mxu0  ;;  %v1019_v56 = vpop.f32.mrb[12].mxu1 }
 0x25a   : > { %v907_v57 = vadd.f32 %v906_v55, %v2681_v23  ;;  %v1020_v58 = vadd.f32 %v1019_v56, %v2683_v24  ;;  %v908_v59 = vpop.f32.mrb[13].mxu0  ;;  %v1021_v60 = vpop.f32.mrb[13].mxu1 }
 0x25b   : > { %v909_v61 = vadd.f32 %v908_v59, %v2687_v25  ;;  %v1022_v62 = vadd.f32 %v1021_v60, %v2689_v26  ;;  %v910_v63 = vpop.f32.mrb[14].mxu0  ;;  %v1023_v0 = vpop.f32.mrb[14].mxu1  ;;  %1612 = vmatprep.mubr.bf16.mxu1 %v1141_v53  ;;  %1725 = vmatprep.mubr.bf16.mxu0 %v1143_v54 }
 0x25c   : > { %v1094_v1 = vmax.f32 %v1020_v58, 0.0  ;;  %v911_v2 = vadd.f32 %v910_v63, %v2681_v23  ;;  %v1024_v3 = vadd.f32 %v1023_v0, %v2683_v24  ;;  %v912_v4 = vpop.f32.mrb[15].mxu0  ;;  %v1025_v5 = vpop.f32.mrb[15].mxu1  ;;  %1613 = vmatmul.mubr.bf16.gmra.mrb[40].mxu1 %v1140_v51  ;;  %1726 = vmatmul.mubr.bf16.gmra.mrb[40].mxu0 %v1142_v52  ;;  %v1092_v9 = vmax.f32 %v907_v57, 0.0 }
 0x25d   : > { %v1095_v6 = vmax.f32 %v1022_v62, 0.0  ;;  %v913_v7 = vadd.f32 %v912_v4, %v2687_v25  ;;  %v1026_v8 = vadd.f32 %v1025_v5, %v2689_v26  ;;  %v1093_v12 = vmax.f32 %v909_v61, 0.0 }
 0x25e   : > { %v1096_v10 = vmax.f32 %v911_v2, 0.0  ;;  %v1098_v11 = vmax.f32 %v1024_v3, 0.0 }
 0x25f   : > { %v1097_v41 = vmax.f32 %v913_v7, 0.0  ;;  %v1099_v13 = vmax.f32 %v1026_v8, 0.0 }
 0x260   : > { %v1144_v14 = vpack.c.bf16 %v1096_v10, %v1092_v9  ;;  %v1146_v15 = vpack.c.bf16 %v1098_v11, %v1094_v1 }
 0x261   : > { %v1145_v16 = vpack.c.bf16 %v1097_v41, %v1093_v12  ;;  %v1147_v19 = vpack.c.bf16 %v1099_v13, %v1095_v6  ;;  %v916_v20 = vpop.f32.mrb[16].mxu0  ;;  %v1029_v22 = vpop.f32.mrb[16].mxu1 }
 0x262   : > { %v917_v27 = vadd.f32 %v916_v20, %v2681_v23  ;;  %v1030_v28 = vadd.f32 %v1029_v22, %v2683_v24  ;;  %v918_v29 = vpop.f32.mrb[17].mxu0  ;;  %v1031_v30 = vpop.f32.mrb[17].mxu1 }
 0x263   : > { %v919_v31 = vadd.f32 %v918_v29, %v2687_v25  ;;  %v1032_v32 = vadd.f32 %v1031_v30, %v2689_v26  ;;  %v920_v33 = vpop.f32.mrb[18].mxu0  ;;  %v1033_v34 = vpop.f32.mrb[18].mxu1  ;;  %1622 = vmatprep.mubr.bf16.mxu1 %v1145_v16  ;;  %1735 = vmatprep.mubr.bf16.mxu0 %v1147_v19 }
 0x264   : > { %v1102_v35 = vmax.f32 %v1030_v28, 0.0  ;;  %v921_v36 = vadd.f32 %v920_v33, %v2681_v23  ;;  %v1034_v37 = vadd.f32 %v1033_v34, %v2683_v24  ;;  %v922_v38 = vpop.f32.mrb[19].mxu0  ;;  %v1035_v39 = vpop.f32.mrb[19].mxu1  ;;  %1623 = vmatmul.mubr.bf16.gmra.mrb[44].mxu1 %v1144_v14  ;;  %1736 = vmatmul.mubr.bf16.gmra.mrb[44].mxu0 %v1146_v15  ;;  %v1100_v44 = vmax.f32 %v917_v27, 0.0 }
 0x265   : > { %v1103_v40 = vmax.f32 %v1032_v32, 0.0  ;;  %v923_v42 = vadd.f32 %v922_v38, %v2687_v25  ;;  %v1036_v43 = vadd.f32 %v1035_v39, %v2689_v26  ;;  %v1101_v47 = vmax.f32 %v919_v31, 0.0 }
 0x266   : > { %v1104_v45 = vmax.f32 %v921_v36, 0.0  ;;  %v1106_v46 = vmax.f32 %v1034_v37, 0.0 }
 0x267   : > { %v1105_v48 = vmax.f32 %v923_v42, 0.0  ;;  %v1107_v49 = vmax.f32 %v1036_v43, 0.0 }
 0x268   : > { %v1148_v50 = vpack.c.bf16 %v1104_v45, %v1100_v44  ;;  %v1150_v51 = vpack.c.bf16 %v1106_v46, %v1102_v35 }
 0x269   : > { %v1149_v52 = vpack.c.bf16 %v1105_v48, %v1101_v47  ;;  %v1151_v53 = vpack.c.bf16 %v1107_v49, %v1103_v40  ;;  %v926_v54 = vpop.f32.mrb[20].mxu0  ;;  %v1039_v55 = vpop.f32.mrb[20].mxu1 }
 0x26a   : > { %v927_v56 = vadd.f32 %v926_v54, %v2681_v23  ;;  %v1040_v57 = vadd.f32 %v1039_v55, %v2683_v24  ;;  %v928_v58 = vpop.f32.mrb[21].mxu0  ;;  %v1041_v59 = vpop.f32.mrb[21].mxu1 }
 0x26b   : > { %v929_v60 = vadd.f32 %v928_v58, %v2687_v25  ;;  %v1042_v61 = vadd.f32 %v1041_v59, %v2689_v26  ;;  %v930_v62 = vpop.f32.mrb[22].mxu0  ;;  %v1043_v63 = vpop.f32.mrb[22].mxu1  ;;  %1632 = vmatprep.mubr.bf16.mxu1 %v1149_v52  ;;  %1745 = vmatprep.mubr.bf16.mxu0 %v1151_v53 }
 0x26c   : > { %v1110_v0 = vmax.f32 %v1040_v57, 0.0  ;;  %v931_v1 = vadd.f32 %v930_v62, %v2681_v23  ;;  %v1044_v2 = vadd.f32 %v1043_v63, %v2683_v24  ;;  %v932_v3 = vpop.f32.mrb[23].mxu0  ;;  %v1045_v4 = vpop.f32.mrb[23].mxu1  ;;  %1633 = vmatmul.mubr.bf16.gmra.mrb[48].mxu1 %v1148_v50  ;;  %1746 = vmatmul.mubr.bf16.gmra.mrb[48].mxu0 %v1150_v51  ;;  %v1108_v8 = vmax.f32 %v927_v56, 0.0 }
 0x26d   : > { %v1111_v5 = vmax.f32 %v1042_v61, 0.0  ;;  %v933_v6 = vadd.f32 %v932_v3, %v2687_v25  ;;  %v1046_v7 = vadd.f32 %v1045_v4, %v2689_v26  ;;  %v1109_v11 = vmax.f32 %v929_v60, 0.0 }
 0x26e   : > { %v1112_v9 = vmax.f32 %v931_v1, 0.0  ;;  %v1114_v10 = vmax.f32 %v1044_v2, 0.0 }
 0x26f   : > { %v1113_v12 = vmax.f32 %v933_v6, 0.0  ;;  %v1115_v41 = vmax.f32 %v1046_v7, 0.0 }
 0x270   : > { %v1152_v13 = vpack.c.bf16 %v1112_v9, %v1108_v8  ;;  %v1154_v14 = vpack.c.bf16 %v1114_v10, %v1110_v0 }
 0x271   : > { %v1153_v15 = vpack.c.bf16 %v1113_v12, %v1109_v11  ;;  %v1155_v16 = vpack.c.bf16 %v1115_v41, %v1111_v5  ;;  %v936_v19 = vpop.f32.mrb[24].mxu0  ;;  %v1049_v20 = vpop.f32.mrb[24].mxu1 }
 0x272   : > { %v937_v22 = vadd.f32 %v936_v19, %v2681_v23  ;;  %v1050_v27 = vadd.f32 %v1049_v20, %v2683_v24  ;;  %v938_v28 = vpop.f32.mrb[25].mxu0  ;;  %v1051_v29 = vpop.f32.mrb[25].mxu1 }
 0x273   : > { %v939_v30 = vadd.f32 %v938_v28, %v2687_v25  ;;  %v1052_v31 = vadd.f32 %v1051_v29, %v2689_v26  ;;  %v940_v32 = vpop.f32.mrb[26].mxu0  ;;  %v1053_v33 = vpop.f32.mrb[26].mxu1  ;;  %1642 = vmatprep.mubr.bf16.mxu1 %v1153_v15  ;;  %1755 = vmatprep.mubr.bf16.mxu0 %v1155_v16 }
 0x274   : > { %v1118_v34 = vmax.f32 %v1050_v27, 0.0  ;;  %v941_v35 = vadd.f32 %v940_v32, %v2681_v23  ;;  %v1054_v36 = vadd.f32 %v1053_v33, %v2683_v24  ;;  %v942_v37 = vpop.f32.mrb[27].mxu0  ;;  %v1055_v38 = vpop.f32.mrb[27].mxu1  ;;  %1643 = vmatmul.mubr.bf16.gmra.mrb[52].mxu1 %v1152_v13  ;;  %1756 = vmatmul.mubr.bf16.gmra.mrb[52].mxu0 %v1154_v14  ;;  %v1116_v43 = vmax.f32 %v937_v22, 0.0 }
 0x275   : > { %v1119_v39 = vmax.f32 %v1052_v31, 0.0  ;;  %v943_v40 = vadd.f32 %v942_v37, %v2687_v25  ;;  %v1056_v42 = vadd.f32 %v1055_v38, %v2689_v26  ;;  %v1117_v46 = vmax.f32 %v939_v30, 0.0 }
 0x276   : > { %v1120_v44 = vmax.f32 %v941_v35, 0.0  ;;  %v1122_v45 = vmax.f32 %v1054_v36, 0.0 }
 0x277   : > { %v1121_v47 = vmax.f32 %v943_v40, 0.0  ;;  %v1123_v48 = vmax.f32 %v1056_v42, 0.0 }
 0x278   : > { %v1156_v49 = vpack.c.bf16 %v1120_v44, %v1116_v43  ;;  %v1158_v50 = vpack.c.bf16 %v1122_v45, %v1118_v34 }
 0x279   : > { %v1157_v51 = vpack.c.bf16 %v1121_v47, %v1117_v46  ;;  %v1159_v52 = vpack.c.bf16 %v1123_v48, %v1119_v39  ;;  %v946_v53 = vpop.f32.mrb[28].mxu0  ;;  %v1059_v54 = vpop.f32.mrb[28].mxu1 }
 0x27a   : > { %v947_v55 = vadd.f32 %v946_v53, %v2681_v23  ;;  %v1060_v56 = vadd.f32 %v1059_v54, %v2683_v24  ;;  %v948_v57 = vpop.f32.mrb[29].mxu0  ;;  %v1061_v58 = vpop.f32.mrb[29].mxu1 }
 0x27b   : > { %v949_v59 = vadd.f32 %v948_v57, %v2687_v25  ;;  %v1062_v60 = vadd.f32 %v1061_v58, %v2689_v26  ;;  %v950_v61 = vpop.f32.mrb[30].mxu0  ;;  %v1063_v62 = vpop.f32.mrb[30].mxu1  ;;  %1652 = vmatprep.mubr.bf16.mxu1 %v1157_v51  ;;  %1765 = vmatprep.mubr.bf16.mxu0 %v1159_v52 }
 0x27c   : > { %v1126_v63 = vmax.f32 %v1060_v56, 0.0  ;;  %v951_v0 = vadd.f32 %v950_v61, %v2681_v23  ;;  %v1064_v1 = vadd.f32 %v1063_v62, %v2683_v24  ;;  %v952_v2 = vpop.f32.mrb[31].mxu0  ;;  %v1065_v3 = vpop.f32.mrb[31].mxu1  ;;  %1653 = vmatmul.mubr.bf16.gmra.mrb[56].mxu1 %v1156_v49  ;;  %1766 = vmatmul.mubr.bf16.gmra.mrb[56].mxu0 %v1158_v50  ;;  %v1124_v7 = vmax.f32 %v947_v55, 0.0  ;;  %v1228_v24 = vld [vmem:[%s2904_s7] sm:$0x3] }
 0x27d   : > { %v1127_v4 = vmax.f32 %v1062_v60, 0.0  ;;  %v953_v5 = vadd.f32 %v952_v2, %v2687_v25  ;;  %v1066_v6 = vadd.f32 %v1065_v3, %v2689_v26  ;;  %v1125_v10 = vmax.f32 %v949_v59, 0.0 }
 0x27e   : > { %v1128_v8 = vmax.f32 %v951_v0, 0.0  ;;  %v1130_v9 = vmax.f32 %v1064_v1, 0.0  ;;  %v2760_v25 = vrot.slane %v1228_v24, %v664_v18  ;;  %v2764_v26 = vrot.slane %v1228_v24, %v668_v21 }
 0x27f   : > { %v1129_v11 = vmax.f32 %v953_v5, 0.0  ;;  %v1131_v12 = vmax.f32 %v1066_v6, 0.0 }
 0x280   : > { %v1160_v41 = vpack.c.bf16 %v1128_v8, %v1124_v7  ;;  %v1162_v13 = vpack.c.bf16 %v1130_v9, %v1126_v63 }
 0x281   : > { %v1161_v23 = vpack.c.bf16 %v1129_v11, %v1125_v10  ;;  %v1163_v14 = vpack.c.bf16 %v1131_v12, %v1127_v4 }
 0x283   : > { %1662 = vmatprep.mubr.bf16.mxu1 %v1161_v23  ;;  %1775 = vmatprep.mubr.bf16.mxu0 %v1163_v14 }
 0x284   : > { %1663 = vmatmul.mubr.bf16.gmra.mrb[60].mxu1 %v1160_v41  ;;  %1776 = vmatmul.mubr.bf16.gmra.mrb[60].mxu0 %v1162_v13 }
 0x31f   : > { %v1594_v15 = vpop.f32.mrb[32].mxu1  ;;  %v1707_v16 = vpop.f32.mrb[32].mxu0 }
 0x320   : > { %v1595_v19 = vadd.f32 %v1594_v15, %v2760_v25  ;;  %v1596_v20 = vpop.f32.mrb[33].mxu1  ;;  %v1709_v22 = vpop.f32.mrb[33].mxu0 }
 0x321   : > { %v1597_v27 = vadd.f32 %v1596_v20, %v2764_v26  ;;  %v1598_v28 = vpop.f32.mrb[34].mxu1  ;;  %v1711_v29 = vpop.f32.mrb[34].mxu0 }
 0x322   : > { %v1708_v30 = vadd.f32 %v1707_v16, %v1595_v19  ;;  %v1599_v31 = vadd.f32 %v1598_v28, %v2760_v25  ;;  %v1600_v32 = vpop.f32.mrb[35].mxu1  ;;  %v1713_v18 = vpop.f32.mrb[35].mxu0 }
 0x323   : > { %v1710_v33 = vadd.f32 %v1709_v22, %v1597_v27  ;;  %v1601_v17 = vadd.f32 %v1600_v32, %v2764_v26 }
 0x324   : > { %1786 = vst [vmem:[%s2906_s9] sm:$0xff] %v1708_v30  ;;  %v1712_v21 = vadd.f32 %v1711_v29, %v1599_v31 }
 0x325   : > { %1787 = vst [vmem:[%s2906_s9 + $0x8] sm:$0xff] %v1710_v33  ;;  %v1714_v34 = vadd.f32 %v1713_v18, %v1601_v17 }
 0x326   : > { %1788 = vst [vmem:[%s2906_s9 + $0x10] sm:$0xff] %v1712_v21 }
 0x327   : > { %1789 = vst [vmem:[%s2906_s9 + $0x18] sm:$0xff] %v1714_v34  ;;  %v1604_v35 = vpop.f32.mrb[36].mxu1  ;;  %v1717_v36 = vpop.f32.mrb[36].mxu0 }
 0x328   : > { %v1605_v37 = vadd.f32 %v1604_v35, %v2760_v25  ;;  %v1606_v38 = vpop.f32.mrb[37].mxu1  ;;  %v1719_v39 = vpop.f32.mrb[37].mxu0 }
 0x329   : > { %v1607_v40 = vadd.f32 %v1606_v38, %v2764_v26  ;;  %v1608_v42 = vpop.f32.mrb[38].mxu1  ;;  %v1721_v43 = vpop.f32.mrb[38].mxu0 }
 0x32a   : > { %v1718_v44 = vadd.f32 %v1717_v36, %v1605_v37  ;;  %v1609_v45 = vadd.f32 %v1608_v42, %v2760_v25  ;;  %v1610_v46 = vpop.f32.mrb[39].mxu1  ;;  %v1723_v47 = vpop.f32.mrb[39].mxu0 }
 0x32b   : > { %v1720_v48 = vadd.f32 %v1719_v39, %v1607_v40  ;;  %v1611_v49 = vadd.f32 %v1610_v46, %v2764_v26 }
 0x32c   : > { %1790 = vst [vmem:[%s2906_s9 + $0x20] sm:$0xff] %v1718_v44  ;;  %v1722_v50 = vadd.f32 %v1721_v43, %v1609_v45 }
 0x32d   : > { %1791 = vst [vmem:[%s2906_s9 + $0x28] sm:$0xff] %v1720_v48  ;;  %v1724_v51 = vadd.f32 %v1723_v47, %v1611_v49 }
 0x32e   : > { %1792 = vst [vmem:[%s2906_s9 + $0x30] sm:$0xff] %v1722_v50 }
 0x32f   : > { %1793 = vst [vmem:[%s2906_s9 + $0x38] sm:$0xff] %v1724_v51  ;;  %v1614_v52 = vpop.f32.mrb[40].mxu1  ;;  %v1727_v53 = vpop.f32.mrb[40].mxu0 }
 0x330   : > { %v1615_v54 = vadd.f32 %v1614_v52, %v2760_v25  ;;  %v1616_v55 = vpop.f32.mrb[41].mxu1  ;;  %v1729_v56 = vpop.f32.mrb[41].mxu0 }
 0x331   : > { %v1617_v57 = vadd.f32 %v1616_v55, %v2764_v26  ;;  %v1618_v58 = vpop.f32.mrb[42].mxu1  ;;  %v1731_v59 = vpop.f32.mrb[42].mxu0 }
 0x332   : > { %v1728_v60 = vadd.f32 %v1727_v53, %v1615_v54  ;;  %v1619_v61 = vadd.f32 %v1618_v58, %v2760_v25  ;;  %v1620_v62 = vpop.f32.mrb[43].mxu1  ;;  %v1733_v63 = vpop.f32.mrb[43].mxu0 }
 0x333   : > { %v1730_v0 = vadd.f32 %v1729_v56, %v1617_v57  ;;  %v1621_v1 = vadd.f32 %v1620_v62, %v2764_v26 }
 0x334   : > { %1794 = vst [vmem:[%s2906_s9 + $0x40] sm:$0xff] %v1728_v60  ;;  %v1732_v2 = vadd.f32 %v1731_v59, %v1619_v61 }
 0x335   : > { %1795 = vst [vmem:[%s2906_s9 + $0x48] sm:$0xff] %v1730_v0  ;;  %v1734_v3 = vadd.f32 %v1733_v63, %v1621_v1 }
 0x336   : > { %1796 = vst [vmem:[%s2906_s9 + $0x50] sm:$0xff] %v1732_v2 }
 0x337   : > { %1797 = vst [vmem:[%s2906_s9 + $0x58] sm:$0xff] %v1734_v3  ;;  %v1624_v4 = vpop.f32.mrb[44].mxu1  ;;  %v1737_v5 = vpop.f32.mrb[44].mxu0 }
 0x338   : > { %v1625_v6 = vadd.f32 %v1624_v4, %v2760_v25  ;;  %v1626_v7 = vpop.f32.mrb[45].mxu1  ;;  %v1739_v8 = vpop.f32.mrb[45].mxu0 }
 0x339   : > { %v1627_v9 = vadd.f32 %v1626_v7, %v2764_v26  ;;  %v1628_v10 = vpop.f32.mrb[46].mxu1  ;;  %v1741_v11 = vpop.f32.mrb[46].mxu0 }
 0x33a   : > { %v1738_v12 = vadd.f32 %v1737_v5, %v1625_v6  ;;  %v1629_v41 = vadd.f32 %v1628_v10, %v2760_v25  ;;  %v1630_v13 = vpop.f32.mrb[47].mxu1  ;;  %v1743_v23 = vpop.f32.mrb[47].mxu0 }
 0x33b   : > { %v1740_v14 = vadd.f32 %v1739_v8, %v1627_v9  ;;  %v1631_v24 = vadd.f32 %v1630_v13, %v2764_v26 }
 0x33c   : > { %1798 = vst [vmem:[%s2906_s9 + $0x60] sm:$0xff] %v1738_v12  ;;  %v1742_v15 = vadd.f32 %v1741_v11, %v1629_v41 }
 0x33d   : > { %1799 = vst [vmem:[%s2906_s9 + $0x68] sm:$0xff] %v1740_v14  ;;  %v1744_v16 = vadd.f32 %v1743_v23, %v1631_v24 }
 0x33e   : > { %1800 = vst [vmem:[%s2906_s9 + $0x70] sm:$0xff] %v1742_v15 }
 0x33f   : > { %1801 = vst [vmem:[%s2906_s9 + $0x78] sm:$0xff] %v1744_v16  ;;  %v1634_v19 = vpop.f32.mrb[48].mxu1  ;;  %v1747_v20 = vpop.f32.mrb[48].mxu0 }
 0x340   : > { %v1635_v22 = vadd.f32 %v1634_v19, %v2760_v25  ;;  %v1636_v27 = vpop.f32.mrb[49].mxu1  ;;  %v1749_v28 = vpop.f32.mrb[49].mxu0 }
 0x341   : > { %v1637_v29 = vadd.f32 %v1636_v27, %v2764_v26  ;;  %v1638_v30 = vpop.f32.mrb[50].mxu1  ;;  %v1751_v31 = vpop.f32.mrb[50].mxu0 }
 0x342   : > { %v1748_v32 = vadd.f32 %v1747_v20, %v1635_v22  ;;  %v1639_v18 = vadd.f32 %v1638_v30, %v2760_v25  ;;  %v1640_v33 = vpop.f32.mrb[51].mxu1  ;;  %v1753_v17 = vpop.f32.mrb[51].mxu0 }
 0x343   : > { %v1750_v21 = vadd.f32 %v1749_v28, %v1637_v29  ;;  %v1641_v34 = vadd.f32 %v1640_v33, %v2764_v26 }
 0x344   : > { %1802 = vst [vmem:[%s2906_s9 + $0x80] sm:$0xff] %v1748_v32  ;;  %v1752_v35 = vadd.f32 %v1751_v31, %v1639_v18 }
 0x345   : > { %1803 = vst [vmem:[%s2906_s9 + $0x88] sm:$0xff] %v1750_v21  ;;  %v1754_v36 = vadd.f32 %v1753_v17, %v1641_v34 }
 0x346   : > { %1804 = vst [vmem:[%s2906_s9 + $0x90] sm:$0xff] %v1752_v35 }
 0x347   : > { %1805 = vst [vmem:[%s2906_s9 + $0x98] sm:$0xff] %v1754_v36  ;;  %v1644_v37 = vpop.f32.mrb[52].mxu1  ;;  %v1757_v38 = vpop.f32.mrb[52].mxu0 }
 0x348   : > { %v1645_v39 = vadd.f32 %v1644_v37, %v2760_v25  ;;  %v1646_v40 = vpop.f32.mrb[53].mxu1  ;;  %v1759_v42 = vpop.f32.mrb[53].mxu0 }
 0x349   : > { %v1647_v43 = vadd.f32 %v1646_v40, %v2764_v26  ;;  %v1648_v44 = vpop.f32.mrb[54].mxu1  ;;  %v1761_v45 = vpop.f32.mrb[54].mxu0 }
 0x34a   : > { %v1758_v46 = vadd.f32 %v1757_v38, %v1645_v39  ;;  %v1649_v47 = vadd.f32 %v1648_v44, %v2760_v25  ;;  %v1650_v48 = vpop.f32.mrb[55].mxu1  ;;  %v1763_v49 = vpop.f32.mrb[55].mxu0 }
 0x34b   : > { %v1760_v50 = vadd.f32 %v1759_v42, %v1647_v43  ;;  %v1651_v51 = vadd.f32 %v1650_v48, %v2764_v26 }
 0x34c   : > { %1806 = vst [vmem:[%s2906_s9 + $0xa0] sm:$0xff] %v1758_v46  ;;  %v1762_v52 = vadd.f32 %v1761_v45, %v1649_v47 }
 0x34d   : > { %1807 = vst [vmem:[%s2906_s9 + $0xa8] sm:$0xff] %v1760_v50  ;;  %v1764_v53 = vadd.f32 %v1763_v49, %v1651_v51 }
 0x34e   : > { %1808 = vst [vmem:[%s2906_s9 + $0xb0] sm:$0xff] %v1762_v52 }
 0x34f   : > { %1809 = vst [vmem:[%s2906_s9 + $0xb8] sm:$0xff] %v1764_v53  ;;  %v1654_v54 = vpop.f32.mrb[56].mxu1  ;;  %v1767_v55 = vpop.f32.mrb[56].mxu0 }
 0x350   : > { %v1655_v56 = vadd.f32 %v1654_v54, %v2760_v25  ;;  %v1656_v57 = vpop.f32.mrb[57].mxu1  ;;  %v1769_v58 = vpop.f32.mrb[57].mxu0 }
 0x351   : > { %v1657_v59 = vadd.f32 %v1656_v57, %v2764_v26  ;;  %v1658_v60 = vpop.f32.mrb[58].mxu1  ;;  %v1771_v61 = vpop.f32.mrb[58].mxu0 }
 0x352   : > { %v1768_v62 = vadd.f32 %v1767_v55, %v1655_v56  ;;  %v1659_v63 = vadd.f32 %v1658_v60, %v2760_v25  ;;  %v1660_v0 = vpop.f32.mrb[59].mxu1  ;;  %v1773_v1 = vpop.f32.mrb[59].mxu0 }
 0x353   : > { %v1770_v2 = vadd.f32 %v1769_v58, %v1657_v59  ;;  %v1661_v3 = vadd.f32 %v1660_v0, %v2764_v26 }
 0x354   : > { %1810 = vst [vmem:[%s2906_s9 + $0xc0] sm:$0xff] %v1768_v62  ;;  %v1772_v4 = vadd.f32 %v1771_v61, %v1659_v63 }
 0x355   : > { %1811 = vst [vmem:[%s2906_s9 + $0xc8] sm:$0xff] %v1770_v2  ;;  %v1774_v5 = vadd.f32 %v1773_v1, %v1661_v3 }
 0x356   : > { %1812 = vst [vmem:[%s2906_s9 + $0xd0] sm:$0xff] %v1772_v4 }
 0x357   : > { %1813 = vst [vmem:[%s2906_s9 + $0xd8] sm:$0xff] %v1774_v5  ;;  %v1664_v6 = vpop.f32.mrb[60].mxu1  ;;  %v1777_v7 = vpop.f32.mrb[60].mxu0 }
 0x358   : > { %v1665_v8 = vadd.f32 %v1664_v6, %v2760_v25  ;;  %v1666_v9 = vpop.f32.mrb[61].mxu1  ;;  %v1779_v10 = vpop.f32.mrb[61].mxu0 }
 0x359   : > { %v1667_v11 = vadd.f32 %v1666_v9, %v2764_v26  ;;  %v1668_v12 = vpop.f32.mrb[62].mxu1  ;;  %v1781_v41 = vpop.f32.mrb[62].mxu0 }
 0x35a   : > { %v1778_v13 = vadd.f32 %v1777_v7, %v1665_v8  ;;  %v1669_v23 = vadd.f32 %v1668_v12, %v2760_v25  ;;  %v1670_v14 = vpop.f32.mrb[63].mxu1  ;;  %v1783_v24 = vpop.f32.mrb[63].mxu0 }
 0x35b   : > { %v1780_v15 = vadd.f32 %v1779_v10, %v1667_v11  ;;  %v1671_v16 = vadd.f32 %v1670_v14, %v2764_v26 }
 0x35c   : > { %1814 = vst [vmem:[%s2906_s9 + $0xe0] sm:$0xff] %v1778_v13  ;;  %v1782_v19 = vadd.f32 %v1781_v41, %v1669_v23 }
 0x35d   : > { %1815 = vst [vmem:[%s2906_s9 + $0xe8] sm:$0xff] %v1780_v15  ;;  %v1784_v20 = vadd.f32 %v1783_v24, %v1671_v16 }
 0x35e   : > { %1816 = vst [vmem:[%s2906_s9 + $0xf0] sm:$0xff] %v1782_v19 }
 0x35f   : > { %1817 = vst [vmem:[%s2906_s9 + $0xf8] sm:$0xff] %v1784_v20 }
 0x360 PF: > { %s22_s30 = sadd.s32 1, %s2440_s30  }
 0x361   : > { %p19_p11 = scmp.ge.s32.totalorder %s22_s30, 10  }
 0x363   :  { %21 = sbr.rel (!%p19_p11) target bundleno = 2 (0x2), region = 108 }
 0x36a   :  { %1845 = vsyncpa [#allocation5], 1 }
 0x36b   :  { %1847 = vsyncpa [#allocation5 + $0x1], 1 }
 0x36c   :  { %1848 = vsyncpa [#allocation7], 1 }

</bundles_post_ra>
